<compile_context>
chip_gen: v7x
topology: tpu7x:2x2x1
jax: 0.10.0
libtpu: 0.0.40
codegen_flags: <defaults>
</compile_context>

<pallas_src>
import math

import jax
import jax.numpy as jnp
from jax.experimental import pallas as pl
from jax.experimental.pallas import tpu as pltpu


def _make_mha_kernel(num_heads, head_dim, mode, has_attn_mask, has_kpm):
    H, D = num_heads, head_dim
    E = H * D

    def kernel(*refs):
        o_ref = refs[-1]
        inputs = refs[:-1]
        idx = 0
        if mode == "qkv":
            x_ref = inputs[0]
            idx = 1
        elif mode == "qk_v":
            qk_ref, v_ref = inputs[0], inputs[1]
            idx = 2
        else:
            q_ref, k_ref, v_ref = inputs[0], inputs[1], inputs[2]
            idx = 3
        res_ref = inputs[idx]
        idx += 1
        am_ref = None
        kpm_ref = None
        if has_attn_mask:
            am_ref = inputs[idx]
            idx += 1
        if has_kpm:
            kpm_ref = inputs[idx]
            idx += 1
        w_qkv_ref, b_qkv_ref, wo_ref, bo_ref = inputs[idx:idx + 4]

        f32 = jnp.float32

        # --- fused input projections (bias added in f32 accumulator, result
        #     cast back to the MXU operand dtype so bf16 stays on bf16 MXU) ---
        if mode == "qkv":
            x_in = x_ref[0]
            cdt = x_in.dtype
            proj = (jnp.dot(x_in, w_qkv_ref[...], preferred_element_type=f32)
                    + b_qkv_ref[...].astype(f32)).astype(cdt)
            q = proj[:, :E]
            k = proj[:, E:2 * E]
            v = proj[:, 2 * E:]
        elif mode == "qk_v":
            qk_in = qk_ref[0]
            v_in = v_ref[0]
            cdt = qk_in.dtype
            qk = (jnp.dot(qk_in, w_qkv_ref[:, :2 * E], preferred_element_type=f32)
                  + b_qkv_ref[:, :2 * E].astype(f32)).astype(cdt)
            q = qk[:, :E]
            k = qk[:, E:]
            v = (jnp.dot(v_in, w_qkv_ref[:, 2 * E:], preferred_element_type=f32)
                 + b_qkv_ref[:, 2 * E:].astype(f32)).astype(cdt)
        else:
            q_in = q_ref[0]
            k_in = k_ref[0]
            v_in = v_ref[0]
            cdt = q_in.dtype
            q = (jnp.dot(q_in, w_qkv_ref[:, :E], preferred_element_type=f32)
                 + b_qkv_ref[:, :E].astype(f32)).astype(cdt)
            k = (jnp.dot(k_in, w_qkv_ref[:, E:2 * E], preferred_element_type=f32)
                 + b_qkv_ref[:, E:2 * E].astype(f32)).astype(cdt)
            v = (jnp.dot(v_in, w_qkv_ref[:, 2 * E:], preferred_element_type=f32)
                 + b_qkv_ref[:, 2 * E:].astype(f32)).astype(cdt)

        Lq_b = q.shape[0]
        Lk = k.shape[0]

        # --- batched per-head attention (no per-head loop / concat) ---
        qh = jnp.transpose(q.reshape(Lq_b, H, D), (1, 0, 2))     # (H, Lq_b, D)
        kh = jnp.transpose(k.reshape(Lk, H, D), (1, 0, 2))       # (H, Lk, D)
        vh = jnp.transpose(v.reshape(Lk, H, D), (1, 0, 2))       # (H, Lk, D)
        s = jnp.einsum("hqd,hkd->hqk", qh, kh,
                       preferred_element_type=f32)               # (H, Lq_b, Lk)
        if has_attn_mask:
            s = s + am_ref[...][None, :, :]                      # (Lq_b, Lk)
        if has_kpm:
            s = s + kpm_ref[...]                                 # (1, 1, Lk)
        m = jnp.max(s, axis=-1, keepdims=True)
        p = jnp.exp(s - m)
        l = jnp.sum(p, axis=-1, keepdims=True)                   # (H, Lq_b, 1)
        ctx = jnp.einsum("hqk,hkd->hqd", p.astype(cdt), vh,
                         preferred_element_type=f32)             # (H, Lq_b, D)
        ctx = ctx * pl.reciprocal(l, approx=True)                # EUP slot
        ctx = jnp.transpose(ctx, (1, 0, 2)).reshape(Lq_b, E)     # (Lq_b, E)

        # --- output projection + residual connection ---
        out = (jnp.dot(ctx.astype(cdt), wo_ref[...], preferred_element_type=f32)
               + bo_ref[...].astype(f32))
        # TODO(synk): dropout on attn weights / output is eval-mode identity (p=0.0).
        o_ref[0] = (res_ref[0].astype(f32) + out).astype(o_ref.dtype)

    return kernel


def init_mha_params(key, embed_dims):
    """Deterministic parameter init matching nn.MultiheadAttention shapes."""
    k1, k2, k3 = jax.random.split(key, 3)
    bound = 1.0 / math.sqrt(embed_dims)
    in_proj_weight = jax.random.uniform(
        k1, (3 * embed_dims, embed_dims), jnp.float32, -bound, bound)
    in_proj_bias = jax.random.uniform(
        k2, (3 * embed_dims,), jnp.float32, -bound, bound)
    out_proj_weight = jax.random.uniform(
        k3, (embed_dims, embed_dims), jnp.float32, -bound, bound)
    out_proj_bias = jnp.zeros((embed_dims,), jnp.float32)
    return dict(in_proj_weight=in_proj_weight, in_proj_bias=in_proj_bias,
                out_proj_weight=out_proj_weight, out_proj_bias=out_proj_bias)


def multihead_attention(params, num_heads, x, key=None, value=None,
                        residual=None, query_pos=None, key_pos=None,
                        attn_mask=None, key_padding_mask=None):
    """Forward mirroring the PyTorch MultiheadAttention wrapper.

    x/key/value/residual/query_pos/key_pos: [L, B, E] (seq-first layout).
    attn_mask: optional bool [Lq, Lk] (True = masked).
    key_padding_mask: optional bool [B, Lk] (True = masked).
    Returns [Lq, B, E].
    """
    query = x
    if key is None:
        key = query
    if value is None:
        value = key
    if residual is None:
        residual = x
    if key_pos is None:
        if query_pos is not None and query_pos.shape == key.shape:
            key_pos = query_pos

    # Positional encodings. NOTE: value never gets a pos encoding (matches the
    # PyTorch module, where value is captured before pos is added).
    q_in = query + query_pos if query_pos is not None else query
    if (key is query) and (key_pos is query_pos):
        k_in = q_in                      # alias -> enables fused QK projection
    else:
        k_in = key + key_pos if key_pos is not None else key
    v_in = value

    Lq, B, E = q_in.shape
    Lk = k_in.shape[0]
    H = num_heads
    assert E % H == 0
    D = E // H
    dtype = q_in.dtype

    # Lq tiling (second "parallel" grid axis).
    if Lq <= 256:
        tq = Lq
    elif Lq % 128 == 0:
        tq = 128
    else:
        tq = Lq      # TODO(synk): ragged-Lq tiling for non-multiple-of-128 lengths.
    nq = Lq // tq

    if nq == 1 and (k_in is q_in) and (v_in is q_in):
        mode = "qkv"       # pure self-attention: single fused QKV dot
    elif nq == 1 and (k_in is q_in):
        mode = "qk_v"      # DETR self-attn with pos: fused QK dot + V dot
    else:
        mode = "separate"

    def to_b(a):                          # (L,B,E) -> (B,L,E)
        return jnp.transpose(a, (1, 0, 2))

    # Fused in-projection weight (E, 3E); 1/sqrt(D) folded into the Q columns.
    w_in = params["in_proj_weight"].astype(jnp.float32)   # (3E, E)
    b_in = params["in_proj_bias"].astype(jnp.float32)     # (3E,)
    scale = 1.0 / math.sqrt(D)
    w_qkv = jnp.concatenate(
        [(w_in[:E] * scale).T, w_in[E:2 * E].T, w_in[2 * E:].T],
        axis=1).astype(dtype)                              # (E, 3E)
    b_qkv = jnp.concatenate(
        [b_in[:E] * scale, b_in[E:2 * E], b_in[2 * E:]]).reshape(1, 3 * E)
    wo = params["out_proj_weight"].astype(jnp.float32).T.astype(dtype)   # (E, E)
    bo = params["out_proj_bias"].astype(jnp.float32).reshape(1, E)

    q_tile_spec = pl.BlockSpec((1, tq, E), lambda b, i: (b, i, 0))
    q_full_spec = pl.BlockSpec((1, Lq, E), lambda b, i: (b, 0, 0))
    kv_spec = pl.BlockSpec((1, Lk, E), lambda b, i: (b, 0, 0))

    if mode == "qkv":
        data_inputs = [to_b(q_in)]
        data_specs = [q_full_spec]
    elif mode == "qk_v":
        data_inputs = [to_b(q_in), to_b(v_in)]
        data_specs = [q_full_spec, kv_spec]
    else:
        data_inputs = [to_b(q_in), to_b(k_in), to_b(v_in)]
        data_specs = [q_tile_spec, kv_spec, kv_spec]

    inputs = list(data_inputs) + [to_b(residual)]
    specs = list(data_specs) + [q_tile_spec]

    has_am = attn_mask is not None
    has_kpm = key_padding_mask is not None
    neg = jnp.float32(-1e30)
    if has_am:
        am = jnp.where(attn_mask.astype(bool), neg, jnp.float32(0.0))   # (Lq, Lk)
        inputs.append(am)
        specs.append(pl.BlockSpec((tq, Lk), lambda b, i: (i, 0)))
    if has_kpm:
        kpm = jnp.where(key_padding_mask.astype(bool), neg,
                        jnp.float32(0.0)).reshape(B, 1, Lk)             # (B, 1, Lk)
        inputs.append(kpm)
        specs.append(pl.BlockSpec((1, 1, Lk), lambda b, i: (b, 0, 0)))

    inputs += [w_qkv, b_qkv, wo, bo]
    specs += [pl.BlockSpec((E, 3 * E), lambda b, i: (0, 0)),
              pl.BlockSpec((1, 3 * E), lambda b, i: (0, 0)),
              pl.BlockSpec((E, E), lambda b, i: (0, 0)),
              pl.BlockSpec((1, E), lambda b, i: (0, 0))]

    kernel = _make_mha_kernel(H, D, mode, has_am, has_kpm)

    out_b = pl.pallas_call(
        kernel,
        out_shape=jax.ShapeDtypeStruct((B, Lq, E), dtype),
        grid=(B, nq),
        in_specs=specs,
        out_specs=pl.BlockSpec((1, tq, E), lambda b, i: (b, i, 0)),
        compiler_params=pltpu.CompilerParams(
            dimension_semantics=("parallel", "parallel")),
    )(*inputs)

    return jnp.transpose(out_b, (1, 0, 2))                 # (Lq, B, E)


def _reference(params, num_heads, x, key=None, value=None, residual=None,
               query_pos=None, key_pos=None, attn_mask=None,
               key_padding_mask=None):
    """Pure-JAX reference reproducing the PyTorch module exactly (dropout=0)."""
    query = x
    if key is None:
        key = query
    if value is None:
        value = key
    if residual is None:
        residual = x
    if key_pos is None:
        if query_pos is not None and query_pos.shape == key.shape:
            key_pos = query_pos
    if query_pos is not None:
        query = query + query_pos
    if key_pos is not None:
        key = key + key_pos

    query = query.astype(jnp.float32)
    key = key.astype(jnp.float32)
    value = value.astype(jnp.float32)
    Lq, B, E = query.shape
    Lk = key.shape[0]
    H = num_heads
    D = E // H
    w_in = params["in_proj_weight"]
    b_in = params["in_proj_bias"]
    q = jnp.einsum("lbe,fe->lbf", query, w_in[:E]) + b_in[:E]
    k = jnp.einsum("lbe,fe->lbf", key, w_in[E:2 * E]) + b_in[E:2 * E]
    v = jnp.einsum("lbe,fe->lbf", value, w_in[2 * E:]) + b_in[2 * E:]
    q = q.reshape(Lq, B, H, D).transpose(1, 2, 0, 3) * (D ** -0.5)   # (B,H,Lq,D)
    k = k.reshape(Lk, B, H, D).transpose(1, 2, 0, 3)
    v = v.reshape(Lk, B, H, D).transpose(1, 2, 0, 3)
    s = jnp.einsum("bhqd,bhkd->bhqk", q, k)
    if attn_mask is not None:
        s = s + jnp.where(attn_mask.astype(bool), -1e30, 0.0)[None, None]
    if key_padding_mask is not None:
        s = s + jnp.where(key_padding_mask.astype(bool), -1e30, 0.0)[:, None, None, :]
    p = jax.nn.softmax(s, axis=-1)
    ctx = jnp.einsum("bhqk,bhkd->bhqd", p, v)
    ctx = ctx.transpose(2, 0, 1, 3).reshape(Lq, B, E)
    out = ctx @ params["out_proj_weight"].T + params["out_proj_bias"]
    return residual.astype(jnp.float32) + out


if __name__ == "__main__":
    # x: [num_query, bs, embed_dims] = [16, 2, 32], num_heads = 4.
    L, B, E, H = 16, 2, 32, 4
    key0 = jax.random.PRNGKey(0)
    kx, kp, kw = jax.random.split(key0, 3)
    x = jax.random.normal(kx, (L, B, E), jnp.float32)
    query_pos = jax.random.normal(kp, (L, B, E), jnp.float32)
    params = init_mha_params(kw, E)

    # 1) DETR self-attention with positional encoding (fused-QK path).
    out = jax.block_until_ready(multihead_attention(params, H, x, query_pos=query_pos))
    ref = _reference(params, H, x, query_pos=query_pos)
    assert out.shape == (L, B, E)
    assert jnp.allclose(out, ref, atol=5e-3, rtol=5e-3), "mismatch (query_pos) vs reference"

    # 2) Pure self-attention, no positional encoding (fully fused QKV path).
    out2 = jax.block_until_ready(multihead_attention(params, H, x))
    ref2 = _reference(params, H, x)
    assert jnp.allclose(out2, ref2, atol=5e-3, rtol=5e-3), "mismatch (no pos) vs reference"

    # 3) attn_mask + key_padding_mask path (compact masks, bias built in-kernel).
    attn_mask = jnp.zeros((L, L), dtype=bool).at[:, L - 1].set(True)
    key_padding_mask = jnp.zeros((B, L), dtype=bool).at[1, L - 2:].set(True)
    out3 = jax.block_until_ready(
        multihead_attention(params, H, x, query_pos=query_pos,
                            attn_mask=attn_mask,
                            key_padding_mask=key_padding_mask))
    ref3 = _reference(params, H, x, query_pos=query_pos,
                      attn_mask=attn_mask, key_padding_mask=key_padding_mask)
    assert jnp.allclose(out3, ref3, atol=5e-3, rtol=5e-3), "mismatch (masked) vs reference"

    # 4) bf16 smoke test (bf16 MXU operands, f32 accumulation in-kernel).
    out_bf16 = jax.block_until_ready(
        multihead_attention(params, H, x.astype(jnp.bfloat16),
                            query_pos=query_pos.astype(jnp.bfloat16)))
    assert out_bf16.dtype == jnp.bfloat16
    assert bool(jnp.all(jnp.isfinite(out_bf16.astype(jnp.float32))))

    print("KERNEL_OK")
</pallas_src>

<mosaic_0001>
module attributes {stable_mosaic.version = 11 : i64} {
  func.func @kernel(%arg0: i32, %arg1: i32, %arg2: memref<1x16x32xf32, #tpu.memory_space<vmem>>, %arg3: memref<1x16x32xf32, #tpu.memory_space<vmem>>, %arg4: memref<1x16x32xf32, #tpu.memory_space<vmem>>, %arg5: memref<32x96xf32, #tpu.memory_space<vmem>>, %arg6: memref<1x96xf32, #tpu.memory_space<vmem>>, %arg7: memref<32x32xf32, #tpu.memory_space<vmem>>, %arg8: memref<1x32xf32, #tpu.memory_space<vmem>>, %arg9: memref<1x16x32xf32, #tpu.memory_space<vmem>>) attributes {dimension_semantics = [#tpu.dimension_semantics<parallel>, #tpu.dimension_semantics<parallel>], iteration_bounds = array<i64: 2, 1>, scalar_prefetch = 0 : i64, scratch_operands = 0 : i64, tpu.core_type = #tpu.core_type<tc>, window_params = [{transform_indices = @transform_0, window_bounds = array<i64: 1, 16, 32>}, {transform_indices = @transform_1, window_bounds = array<i64: 1, 16, 32>}, {transform_indices = @transform_2, window_bounds = array<i64: 1, 16, 32>}, {pipeline_mode = #tpu.pipeline_mode<synchronous>, transform_indices = @transform_3, window_bounds = array<i64: 32, 96>}, {pipeline_mode = #tpu.pipeline_mode<synchronous>, transform_indices = @transform_4, window_bounds = array<i64: 1, 96>}, {pipeline_mode = #tpu.pipeline_mode<synchronous>, transform_indices = @transform_5, window_bounds = array<i64: 32, 32>}, {pipeline_mode = #tpu.pipeline_mode<synchronous>, transform_indices = @transform_6, window_bounds = array<i64: 1, 32>}, {transform_indices = @transform_7, window_bounds = array<i64: 1, 16, 32>}]} {
    %c0 = arith.constant 0 : index
    %c0_0 = arith.constant 0 : index
    %c0_1 = arith.constant 0 : index
    %0 = vector.load %arg2[%c0, %c0_0, %c0_1] : memref<1x16x32xf32, #tpu.memory_space<vmem>>, vector<1x16x32xf32>
    %1 = vector.shape_cast %0 : vector<1x16x32xf32> to vector<16x32xf32>
    %c0_2 = arith.constant 0 : index
    %c0_3 = arith.constant 0 : index
    %c0_4 = arith.constant 0 : index
    %2 = vector.load %arg3[%c0_2, %c0_3, %c0_4] : memref<1x16x32xf32, #tpu.memory_space<vmem>>, vector<1x16x32xf32>
    %3 = vector.shape_cast %2 : vector<1x16x32xf32> to vector<16x32xf32>
    %c0_5 = arith.constant 0 : index
    %c0_6 = arith.constant 0 : index
    %4 = vector.load %arg5[%c0_5, %c0_6] : memref<32x96xf32, #tpu.memory_space<vmem>>, vector<32x64xf32>
    %cst = arith.constant dense<0.000000e+00> : vector<16x64xf32>
    %5 = tpu.matmul %1, %4, %cst {dimension_numbers = #tpu.dot_dimension_numbers<[1], [0], [0], [1], [0, 0, 1, 1], [], []>} : vector<16x32xf32>, vector<32x64xf32>, vector<16x64xf32> -> vector<16x64xf32>
    %c0_7 = arith.constant 0 : index
    %c0_8 = arith.constant 0 : index
    %6 = vector.load %arg6[%c0_7, %c0_8] : memref<1x96xf32, #tpu.memory_space<vmem>>, vector<1x64xf32>
    %7 = vector.broadcast %6 : vector<1x64xf32> to vector<16x64xf32>
    %8 = arith.addf %5, %7 : vector<16x64xf32>
    %9 = vector.extract_strided_slice %8 {offsets = [0, 0], sizes = [16, 32], strides = [1, 1]} : vector<16x64xf32> to vector<16x32xf32>
    %10 = vector.extract_strided_slice %8 {offsets = [0, 32], sizes = [16, 32], strides = [1, 1]} : vector<16x64xf32> to vector<16x32xf32>
    %c0_9 = arith.constant 0 : index
    %c64 = arith.constant 64 : index
    %11 = vector.load %arg5[%c0_9, %c64] : memref<32x96xf32, #tpu.memory_space<vmem>>, vector<32x32xf32>
    %cst_10 = arith.constant dense<0.000000e+00> : vector<16x32xf32>
    %12 = tpu.matmul %3, %11, %cst_10 {dimension_numbers = #tpu.dot_dimension_numbers<[1], [0], [0], [1], [0, 0, 1, 1], [], []>} : vector<16x32xf32>, vector<32x32xf32>, vector<16x32xf32> -> vector<16x32xf32>
    %c0_11 = arith.constant 0 : index
    %c64_12 = arith.constant 64 : index
    %13 = vector.load %arg6[%c0_11, %c64_12] : memref<1x96xf32, #tpu.memory_space<vmem>>, vector<1x32xf32>
    %14 = vector.broadcast %13 : vector<1x32xf32> to vector<16x32xf32>
    %15 = arith.addf %12, %14 : vector<16x32xf32>
    %16 = vector.shape_cast %9 : vector<16x32xf32> to vector<16x4x8xf32>
    %17 = tpu.transpose %16, [1, 0, 2] : vector<16x4x8xf32> -> vector<4x16x8xf32>
    %18 = vector.shape_cast %10 : vector<16x32xf32> to vector<16x4x8xf32>
    %19 = tpu.transpose %18, [1, 0, 2] : vector<16x4x8xf32> -> vector<4x16x8xf32>
    %20 = vector.shape_cast %15 : vector<16x32xf32> to vector<16x4x8xf32>
    %21 = tpu.transpose %20, [1, 0, 2] : vector<16x4x8xf32> -> vector<4x16x8xf32>
    "tpu.trace_start"() <{level = 10 : i32, message = "hqd,hkd->hqk"}> : () -> ()
    %cst_13 = arith.constant dense<0.000000e+00> : vector<4x16x16xf32>
    %22 = tpu.matmul %17, %19, %cst_13 {dimension_numbers = #tpu.dot_dimension_numbers<[2], [2], [1], [1], [0, 0, 0, 1, 1, 1], [0], [0]>} : vector<4x16x8xf32>, vector<4x16x8xf32>, vector<4x16x16xf32> -> vector<4x16x16xf32>
    "tpu.trace_stop"() : () -> ()
    %cst_14 = arith.constant dense<0xFF800000> : vector<4x16xf32>
    %23 = vector.multi_reduction <maximumf>, %22, %cst_14 [2] : vector<4x16x16xf32> to vector<4x16xf32>
    %24 = vector.shape_cast %23 : vector<4x16xf32> to vector<4x16x1xf32>
    %25 = vector.broadcast %24 : vector<4x16x1xf32> to vector<4x16x16xf32>
    %26 = arith.subf %22, %25 : vector<4x16x16xf32>
    %27 = math.exp %26 : vector<4x16x16xf32>
    %cst_15 = arith.constant dense<0.000000e+00> : vector<4x16xf32>
    %28 = vector.multi_reduction <add>, %27, %cst_15 [2] : vector<4x16x16xf32> to vector<4x16xf32>
    %29 = vector.shape_cast %28 : vector<4x16xf32> to vector<4x16x1xf32>
    "tpu.trace_start"() <{level = 10 : i32, message = "hqk,hkd->hqd"}> : () -> ()
    %cst_16 = arith.constant dense<0.000000e+00> : vector<4x16x8xf32>
    %30 = tpu.matmul %27, %21, %cst_16 {dimension_numbers = #tpu.dot_dimension_numbers<[2], [1], [1], [2], [0, 0, 0, 1, 1, 2], [0], [0]>} : vector<4x16x16xf32>, vector<4x16x8xf32>, vector<4x16x8xf32> -> vector<4x16x8xf32>
    "tpu.trace_stop"() : () -> ()
    %31 = tpu.reciprocal %29 {approx = true} : vector<4x16x1xf32> -> vector<4x16x1xf32>
    %32 = vector.broadcast %31 : vector<4x16x1xf32> to vector<4x16x8xf32>
    %33 = arith.mulf %30, %32 : vector<4x16x8xf32>
    %34 = tpu.transpose %33, [1, 0, 2] : vector<4x16x8xf32> -> vector<16x4x8xf32>
    %35 = vector.shape_cast %34 : vector<16x4x8xf32> to vector<16x32xf32>
    %c0_17 = arith.constant 0 : index
    %c0_18 = arith.constant 0 : index
    %36 = vector.load %arg7[%c0_17, %c0_18] : memref<32x32xf32, #tpu.memory_space<vmem>>, vector<32x32xf32>
    %cst_19 = arith.constant dense<0.000000e+00> : vector<16x32xf32>
    %37 = tpu.matmul %35, %36, %cst_19 {dimension_numbers = #tpu.dot_dimension_numbers<[1], [0], [0], [1], [0, 0, 1, 1], [], []>} : vector<16x32xf32>, vector<32x32xf32>, vector<16x32xf32> -> vector<16x32xf32>
    %c0_20 = arith.constant 0 : index
    %c0_21 = arith.constant 0 : index
    %38 = vector.load %arg8[%c0_20, %c0_21] : memref<1x32xf32, #tpu.memory_space<vmem>>, vector<1x32xf32>
    %39 = vector.broadcast %38 : vector<1x32xf32> to vector<16x32xf32>
    %40 = arith.addf %37, %39 : vector<16x32xf32>
    %c0_22 = arith.constant 0 : index
    %c0_23 = arith.constant 0 : index
    %c0_24 = arith.constant 0 : index
    %41 = vector.load %arg4[%c0_22, %c0_23, %c0_24] : memref<1x16x32xf32, #tpu.memory_space<vmem>>, vector<1x16x32xf32>
    %42 = vector.shape_cast %41 : vector<1x16x32xf32> to vector<16x32xf32>
    %43 = arith.addf %42, %40 : vector<16x32xf32>
    %c0_25 = arith.constant 0 : index
    %c0_26 = arith.constant 0 : index
    %c0_27 = arith.constant 0 : index
    %44 = vector.load %arg9[%c0_25, %c0_26, %c0_27] : memref<1x16x32xf32, #tpu.memory_space<vmem>>, vector<1x16x32xf32>
    %45 = vector.shape_cast %44 : vector<1x16x32xf32> to vector<16x32xf32>
    %46 = vector.shape_cast %43 : vector<16x32xf32> to vector<1x16x32xf32>
    tpu.vector_store %arg9[%c0_25, %c0_26, %c0_27], %46 {strides = array<i32>} : memref<1x16x32xf32, #tpu.memory_space<vmem>>, vector<1x16x32xf32>,
    return
  }
  func.func @transform_0(%arg0: i32, %arg1: i32) -> (i32, i32, i32) {
    %c0_i32 = arith.constant 0 : i32
    %c0_i32_0 = arith.constant 0 : i32
    %c0_i32_1 = arith.constant 0 : i32
    return %arg0, %c0_i32, %c0_i32_0 : i32, i32, i32
  }
  func.func @transform_1(%arg0: i32, %arg1: i32) -> (i32, i32, i32) {
    %c0_i32 = arith.constant 0 : i32
    %c0_i32_0 = arith.constant 0 : i32
    %c0_i32_1 = arith.constant 0 : i32
    return %arg0, %c0_i32, %c0_i32_0 : i32, i32, i32
  }
  func.func @transform_2(%arg0: i32, %arg1: i32) -> (i32, i32, i32) {
    %c0_i32 = arith.constant 0 : i32
    %c0_i32_0 = arith.constant 0 : i32
    return %arg0, %arg1, %c0_i32 : i32, i32, i32
  }
  func.func @transform_3(%arg0: i32, %arg1: i32) -> (i32, i32) {
    %c0_i32 = arith.constant 0 : i32
    %c0_i32_0 = arith.constant 0 : i32
    %c0_i32_1 = arith.constant 0 : i32
    return %c0_i32, %c0_i32_0 : i32, i32
  }
  func.func @transform_4(%arg0: i32, %arg1: i32) -> (i32, i32) {
    %c0_i32 = arith.constant 0 : i32
    %c0_i32_0 = arith.constant 0 : i32
    %c0_i32_1 = arith.constant 0 : i32
    return %c0_i32, %c0_i32_0 : i32, i32
  }
  func.func @transform_5(%arg0: i32, %arg1: i32) -> (i32, i32) {
    %c0_i32 = arith.constant 0 : i32
    %c0_i32_0 = arith.constant 0 : i32
    %c0_i32_1 = arith.constant 0 : i32
    return %c0_i32, %c0_i32_0 : i32, i32
  }
  func.func @transform_6(%arg0: i32, %arg1: i32) -> (i32, i32) {
    %c0_i32 = arith.constant 0 : i32
    %c0_i32_0 = arith.constant 0 : i32
    %c0_i32_1 = arith.constant 0 : i32
    return %c0_i32, %c0_i32_0 : i32, i32
  }
  func.func @transform_7(%arg0: i32, %arg1: i32) -> (i32, i32, i32) {
    %c0_i32 = arith.constant 0 : i32
    %c0_i32_0 = arith.constant 0 : i32
    return %arg0, %arg1, %c0_i32 : i32, i32, i32
  }
}

</mosaic_0001>

<bundles_post_ra>
// kernel: tpu_custom_call.1
= control target key start
LH: loop header
LB: loop body
LE: loop exit
PB: predicated region body
PF: predicated region fallthrough
CT: control target
= control target key end

     0   :  { %s4265_s0 = inlined_call_operand.hbm [shape: f32[2,16,32], index: 0, kind: input, shape index: {}]   ;;  %s4266_s1 = inlined_call_operand.hbm [shape: f32[2,16,32], index: 1, kind: input, shape index: {}]   ;;  %s4267_s2 = inlined_call_operand.hbm [shape: f32[2,16,32], index: 2, kind: input, shape index: {}]   ;;  %s4268_s3 = inlined_call_operand.hbm [shape: f32[32,96], index: 3, kind: input, shape index: {}]   ;;  %s4269_s4 = inlined_call_operand.vmem [shape: f32[1,96], index: 4, kind: input, shape index: {}]   ;;  %s4270_s5 = inlined_call_operand.hbm [shape: f32[32,32], index: 5, kind: input, shape index: {}]   ;;  %s4271_s6 = inlined_call_operand.vmem [shape: f32[1,32], index: 6, kind: input, shape index: {}]   ;;  %s4272_s7 = inlined_call_operand.hbm [shape: f32[2,16,32], index: 7, kind: output, shape index: {}]  }
   0x1   :  { %4296 = sst [smem:[#allocation22_spill]] %s4266_s1 }
   0x2   :  { %4297 = sst [smem:[#allocation23_spill]] %s4268_s3 }
   0x3   :  { %4298 = sst [smem:[#allocation24_spill]] %s4270_s5 }
   0x4   :  { %4299 = sst [smem:[#allocation25_spill]] %s4272_s7 }
   0x5   :  { %12 = vsyncpa [#allocation3], 0 }
   0x6   :  { %14 = vsyncpa [#allocation3 + $0x1], 0 }
   0x7   :  { %15 = vsyncpa [#allocation6], 0 }
   0x8   :  { %17 = vsyncpa [#allocation6 + $0x1], 0 }
   0x9   :  { %18 = vsyncpa [#allocation9], 0 }
   0xa   :  { %19 = vsyncpa [#allocation4], 0 }
   0xb   :  { %21 = vsyncpa [#allocation4 + $0x1], 0  ;;  %s3555_s24 = smov 0   ;;  %s3557_s25 = smov 0  }
   0xc   :  { %s3559_s26 = smov 0   ;;  %s3561_s27 = smov 0  }
   0xd   :  { %s3563_s28 = smov 0   ;;  %s3565_s29 = smov 0  }
   0xe LB: > { %4300 = sst [smem:[#allocation16_spill]] %s3474_s24  ;;  %s3586_s30 = sadd.s32 4294967295, %s3494_s29   ;;  %s3494_s29 = sphi %s3565_s29, %s27_s29   ;;  %s3490_s28 = sphi %s3563_s28, %s4342_s28   ;;  %s3486_s27 = sphi %s3561_s27, %s4341_s27   ;;  %s3482_s26 = sphi %s3559_s26, %s4345_s26   ;;  %s3478_s25 = sphi %s3557_s25, %s4344_s25   ;;  %s3474_s24 = sphi %s3555_s24, %s4343_s24  }
   0xf   : > { %4301 = sst [smem:[#allocation17_spill]] %s3490_s28  ;;  %s2829_s8 = sadd.s32 4294967294, %s3494_s29  }
  0x10   : > { %4302 = sst [smem:[#allocation18_spill]] %s3494_s29  ;;  %p53_p0 = scmp.ne.s32.totalorder %s3482_s26, %s3478_s25 }
  0x11   : > { %p54_p1 = scmp.eq.s32.totalorder %s3494_s29, 0  ;;  %p59_p2 = scmp.ne.s32.totalorder %s3478_s25, %s3474_s24 }
  0x12   : > { %p4273_p3 = scmp.eq.s32.totalorder %s3586_s30, 0  ;;  %p223_p5 = scmp.eq.s32.totalorder %s3586_s30, 1 }
  0x13   : > { %p3595_p4 = por %p54_p1, %p53_p0  ;;  %p229_p7 = scmp.eq.s32.totalorder %s2829_s8, 1 }
  0x14   : > { %p3602_p6 = por %p4273_p3, %p59_p2  ;;  %p3606_p8 = por %p223_p5, %p53_p0 }
  0x15   : > { %p2830_p9 = scmp.ge.s32.totalorder %s3494_s29, 1  ;;  %p3611_p10 = por %p229_p7, %p59_p2 }
  0x16   : > { %s4304_s10 = scalar_select %p3602_p6, 1, 0 }
  0x17   : > { %s4305_s11 = scalar_select %p3606_p8, 1, 0 }
  0x18   : > { %s4306_s12 = scalar_select %p3611_p10, 1, 0 }
  0x19   : > { %p236_p11 = scmp.lt.s32.totalorder %s3494_s29, 3  ;;  %s3496_s14 = smov [#allocation8]  }
  0x1a   : > { %4307 = sst [smem:[#allocation19_spill]] %s4306_s12  ;;  %s248_s15 = sshll.u32 %s3496_s14, 4  ;;  %s3620_s15 = int_to_ptr.vmem [resolvable:$true] %s248_s15 }
  0x1b   : > { %p3616_p12 = pnand %p2830_p9, %p236_p11  ;;  %s39_s17 = sadd.s32 1, %s3490_s28 }
  0x1c   : > { %p3633_p2 = scmp.ge.s32.totalorder %s39_s17, 2  ;;  %s4311_s3 = sld [smem:[#allocation23_spill]] }
  0x1d   : > { %s4308_s13 = scalar_select %p3616_p12, 1, 0 }
  0x1e   : > { %p3126_p13 = pneg %p3616_p12 }
  0x20   : > { %p3627_p1 = pnand %p3126_p13, %p4273_p3 }
  0x22   : > { %s4309_s16 = scalar_select %p3627_p1, 1, 0 }
  0x23   : > { %s3258_s22 = scalar_lea.hbm %s4311_s3, 512  ;;  %p4286_p7 = pneg %p3627_p1 }
  0x24   : > { %p3259_p5 = scmp.ne.s32.totalorder %s4311_s3, %s3258_s22  ;;  %p3265_p13 = scmp.lt.u32.totalorder %s3258_s22, %s4311_s3 }
  0x26   : > { %p3261_p9 = pnand %p4286_p7, %p3259_p5 }
  0x28   : > { %p3262_p11 = pneg %p3261_p9 }
  0x2a   : > { %p3267_p0 = pnand %p3265_p13, %p3262_p11 }
  0x2c   : > { %3270 = shalt.err (!%p3267_p0)
}
  0x2d   : > { %s3271_s20 = scalar_lea.vmem %s3620_s15, 512  ;;  %p3279_p6 = scmp.lt.s32.totalorder %s3620_s15, %s3620_s15 }
  0x2e   : > { %p3272_p3 = scmp.ne.s32.totalorder %s3620_s15, %s3271_s20  ;;  %p3280_p5 = scmp.lt.s32.totalorder %s3271_s20, %s3271_s20 }
  0x30   : > { %p3274_p10 = pnand %p3272_p3, %p4286_p7  ;;  %p3281_p9 = por %p3280_p5, %p3279_p6 }
  0x32   : > { %p3275_p8 = pneg %p3274_p10 }
  0x34   : > { %p3282_p12 = pnand %p3281_p9, %p3275_p8 }
  0x36   : > { %3285 = shalt.err (!%p3282_p12)
}
  0x37   : > { %s4279_s18 = smov 128   ;;  %s4282_s21 = smov 8  }
  0x38   : > { %3129 = dma.hbm_to_vmem [thread:$0]  (!%p3627_p1), %s4311_s3, 512, %s3620_s15, [#allocation9], %s4279_s18, %s4279_s18, %s4282_s21  }
  0x39   : > { %s4347_s17 = smov (%p3633_p2, %s39_s17), 0  ;;  %p3149_p3 = scmp.lt.s32.totalorder %s3494_s29, 2 }
  0x3a   : > { %4312 = sst [smem:[#allocation20_spill]] %s4347_s17  ;;  %s4281_s8 = sand.u32 1, %s3482_s26  }
  0x3b   : > { %s43_s14 = ssub.s32 %s3490_s28, %s4347_s17  ;;  %s3677_s20 = sshll.u32 %s4281_s8, 4 }
  0x3c   : > { %p44_p6 = scmp.eq.s32.totalorder %s43_s14, 0  ;;  %s3680_s12 = sshll.u32 %s3490_s28, 8 }
  0x3d   : > { %p3684_p8 = pnand %p3149_p3, %p3595_p4  ;;  %s302_s15 = sand.u32 1, %s3494_s29  }
  0x3e   : > { %s4314_s19 = sadd.s32 1, %s3482_s26  ;;  %s4316_s1 = sld [smem:[#allocation22_spill]] }
  0x3f   : > { %s4313_s24 = scalar_select %p3684_p8, 1, 0 }
  0x40   : > { %s3692_s22 = scalar_select %p44_p6, %s3482_s26, %s4314_s19  }
  0x41   : > { %s306_s9 = scalar_lea.vmem [#allocation5], %s3677_s20  ;;  %s3499_s21 = smov [#allocation10]  }
  0x42   : > { %4315 = sst [smem:[#allocation21_spill]] %s3692_s22  ;;  %s313_s14 = sshll.u32 %s306_s9, 4  ;;  %s3701_s14 = int_to_ptr.vmem [resolvable:$true] %s313_s14 }
  0x43   : > { %s3703_s3 = sshll.u32 %s3499_s21, 4  ;;  %s3705_s17 = scalar_lea.sflag [#allocation6], %s302_s15  ;;  %s265_s3 = int_to_ptr.vmem [resolvable:$true] %s3703_s3 }
  0x44   : > { %s3698_s8 = scalar_lea.hbm %s4316_s1, %s3680_s12  ;;  %p3711_p10 = pneg %p3684_p8 }
  0x45   : > { %s3286_s19 = scalar_lea.hbm %s3698_s8, 256  ;;  %s3291_s28 = scalar_lea.hbm %s4316_s1, 512 }
  0x46   : > { %p3287_p4 = scmp.ne.s32.totalorder %s3698_s8, %s3286_s19  ;;  %p3292_p2 = scmp.lt.u32.totalorder %s3698_s8, %s4316_s1 }
  0x47   : > { %s4317_s18 = scalar_select %p3711_p10, 1, 0 }
  0x48   : > { %p3289_p12 = pnand %p3711_p10, %p3287_p4  ;;  %p3293_p11 = scmp.lt.u32.totalorder %s3291_s28, %s3286_s19 }
  0x49   : > { %p3295_p5 = scmp.lt.u32.totalorder %s3286_s19, %s3698_s8 }
  0x4a   : > { %p3290_p0 = pneg %p3289_p12  ;;  %p3294_p13 = por %p3293_p11, %p3292_p2 }
  0x4c   : > { %p3296_p9 = por %p3295_p5, %p3294_p13 }
  0x4e   : > { %p3297_p3 = pnand %p3296_p9, %p3290_p0 }
  0x50   : > { %3300 = shalt.err (!%p3297_p3)
}
  0x51   : > { %s3301_s15 = scalar_lea.vmem %s3701_s14, 256  ;;  %s3500_s23 = smov [#allocation5]  }
  0x52   : > { %p3302_p6 = scmp.ne.s32.totalorder %s3701_s14, %s3301_s15  ;;  %s3306_s9 = sshll.u32 %s3500_s23, 4  ;;  %s3307_s9 = int_to_ptr.vmem [resolvable:$false] %s3306_s9 }
  0x53   : > { %s3308_s22 = scalar_lea.vmem %s3307_s9, 512  ;;  %p3309_p7 = scmp.lt.s32.totalorder %s3701_s14, %s3307_s9 }
  0x54   : > { %p3304_p4 = pnand %p3302_p6, %p3711_p10  ;;  %p3310_p1 = scmp.lt.s32.totalorder %s3308_s22, %s3301_s15 }
  0x56   : > { %p3305_p12 = pneg %p3304_p4  ;;  %p3311_p2 = por %p3310_p1, %p3309_p7 }
  0x58   : > { %p3312_p11 = pnand %p3311_p2, %p3305_p12 }
  0x5a   : > { %3315 = shalt.err (!%p3312_p11)
}
  0x5b   : > { %s4318_s28 = smov 8   ;;  %s4319_s19 = smov 128  }
  0x5c   : > { %3139 = dma.hbm_to_vmem [thread:$0]  (!%p3684_p8), %s3698_s8, 256, %s3701_s14, %s3705_s17, %s4319_s19, %s4319_s19, %s4318_s28  }
  0x5d   : > { %s4320_s5 = sld [smem:[#allocation24_spill]]  ;;  %p4321_p7 = scmp.ne.s32.totalorder %s4309_s16, 0 }
  0x5f   : > { %p4322_p0 = pneg %p4321_p7 }
  0x63   : > { %s3316_s9 = scalar_lea.hbm %s4320_s5, 512 }
  0x64   : > { %p3317_p1 = scmp.ne.s32.totalorder %s4320_s5, %s3316_s9  ;;  %p3323_p9 = scmp.lt.u32.totalorder %s3316_s9, %s4320_s5 }
  0x66   : > { %p3319_p13 = pnand %p3317_p1, %p4322_p0 }
  0x68   : > { %p3320_p5 = pneg %p3319_p13 }
  0x6a   : > { %p3325_p3 = pnand %p3323_p9, %p3320_p5 }
  0x6c   : > { %3328 = shalt.err (!%p3325_p3)
}
  0x6d   : > { %s3329_s8 = scalar_lea.vmem %s265_s3, 512  ;;  %p4323_p4 = pmov %p4322_p0 }
  0x6e   : > { %p3330_p6 = scmp.ne.s32.totalorder %s265_s3, %s3329_s8  ;;  %p3337_p11 = scmp.lt.s32.totalorder %s265_s3, %s265_s3 }
  0x6f   : > { %p3338_p8 = scmp.lt.s32.totalorder %s3329_s8, %s3329_s8 }
  0x70   : > { %p3332_p12 = pnand %p3330_p6, %p4323_p4 }
  0x71   : > { %p3339_p10 = por %p3338_p8, %p3337_p11 }
  0x72   : > { %p3333_p2 = pneg %p3332_p12 }
  0x74   : > { %p3340_p0 = pnand %p3339_p10, %p3333_p2 }
  0x76   : > { %3343 = shalt.err (!%p3340_p0)
}
  0x77   : > { %3132 = dma.hbm_to_vmem [thread:$0]  (!%p4321_p7), %s4320_s5, 512, %s265_s3, [#allocation9], %s4319_s19, %s4319_s19, %s4318_s28  }
  0x78   : > { %s3766_s23 = scalar_lea.hbm %s4265_s0, %s3680_s12  ;;  %s285_s16 = scalar_lea.vmem [#allocation2], %s3677_s20 }
  0x79   : > { %s292_s9 = sshll.u32 %s285_s16, 4  ;;  %s3775_s8 = scalar_lea.hbm %s4267_s2, %s3680_s12  ;;  %s3769_s9 = int_to_ptr.vmem [resolvable:$true] %s292_s9 }
  0x7a   : > { %s4324_s1 = sand.u32 1, %s3482_s26   ;;  %s3344_s29 = scalar_lea.hbm %s3766_s23, 256 }
  0x7b   : > { %s3779_s3 = scalar_lea.sflag [#allocation3], %s4324_s1  ;;  %p3345_p8 = scmp.ne.s32.totalorder %s3766_s23, %s3344_s29 }
  0x7c   : > { %p4325_p10 = scmp.ne.s32.totalorder %s4317_s18, 0  ;;  %s3349_s5 = scalar_lea.hbm %s4265_s0, 512 }
  0x7d   : > { %p3350_p13 = scmp.lt.u32.totalorder %s3766_s23, %s4265_s0  ;;  %p3351_p5 = scmp.lt.u32.totalorder %s3349_s5, %s3344_s29 }
  0x7e   : > { %p3347_p1 = pnand %p3345_p8, %p4325_p10  ;;  %p3353_p3 = scmp.lt.u32.totalorder %s3344_s29, %s3766_s23 }
  0x7f   : > { %p3352_p9 = por %p3351_p5, %p3350_p13 }
  0x80   : > { %p3348_p7 = pneg %p3347_p1 }
  0x81   : > { %p3354_p6 = por %p3353_p3, %p3352_p9 }
  0x83   : > { %p3355_p4 = pnand %p3354_p6, %p3348_p7 }
  0x85   : > { %3358 = shalt.err (!%p3355_p4)
}
  0x86   : > { %s3359_s12 = scalar_lea.vmem %s3769_s9, 256  ;;  %s3501_s15 = smov [#allocation2]  }
  0x87   : > { %p3360_p12 = scmp.ne.s32.totalorder %s3769_s9, %s3359_s12  ;;  %s3364_s22 = sshll.u32 %s3501_s15, 4  ;;  %s3365_s22 = int_to_ptr.vmem [resolvable:$false] %s3364_s22 }
  0x88   : > { %s3366_s7 = scalar_lea.vmem %s3365_s22, 512  ;;  %p3367_p0 = scmp.lt.s32.totalorder %s3769_s9, %s3365_s22 }
  0x89   : > { %p3362_p2 = pnand %p3360_p12, %p4325_p10  ;;  %p3368_p8 = scmp.lt.s32.totalorder %s3366_s7, %s3359_s12 }
  0x8b   : > { %p3363_p11 = pneg %p3362_p2  ;;  %p3369_p1 = por %p3368_p8, %p3367_p0 }
  0x8d   : > { %p3370_p13 = pnand %p3369_p1, %p3363_p11 }
  0x8f   : > { %3373 = shalt.err (!%p3370_p13)
}
  0x90   : > { %p4326_p7 = scmp.ne.s32.totalorder %s4313_s24, 0  ;;  %s327_s5 = scalar_lea.vmem [#allocation7], %s3677_s20 }
  0x91   : > { %s336_s1 = sshll.u32 %s327_s5, 4  ;;  %s3374_s29 = scalar_lea.hbm %s3775_s8, 256  ;;  %s3807_s1 = int_to_ptr.vmem [resolvable:$true] %s336_s1 }
  0x92   : > { %3136 = dma.hbm_to_vmem [thread:$0]  (!%p4326_p7), %s3766_s23, 256, %s3769_s9, %s3779_s3, %s4319_s19, %s4319_s19, %s4318_s28  }
  0x93   : > { %p3375_p5 = scmp.ne.s32.totalorder %s3775_s8, %s3374_s29  ;;  %s3379_s16 = scalar_lea.hbm %s4267_s2, 512 }
  0x94   : > { %p3380_p6 = scmp.lt.u32.totalorder %s3775_s8, %s4267_s2  ;;  %p3381_p4 = scmp.lt.u32.totalorder %s3379_s16, %s3374_s29 }
  0x95   : > { %p3377_p9 = pnand %p3375_p5, %p4325_p10  ;;  %p3383_p2 = scmp.lt.u32.totalorder %s3374_s29, %s3775_s8 }
  0x96   : > { %p3382_p12 = por %p3381_p4, %p3380_p6 }
  0x97   : > { %p3378_p3 = pneg %p3377_p9 }
  0x98   : > { %p3384_p11 = por %p3383_p2, %p3382_p12 }
  0x9a   : > { %p3385_p0 = pnand %p3384_p11, %p3378_p3 }
  0x9c   : > { %3388 = shalt.err (!%p3385_p0)
}
  0x9d   : > { %s3389_s20 = scalar_lea.vmem %s3807_s1, 256  ;;  %s3502_s23 = smov [#allocation7]  }
  0x9e   : > { %p3390_p8 = scmp.ne.s32.totalorder %s3807_s1, %s3389_s20  ;;  %s3394_s9 = sshll.u32 %s3502_s23, 4  ;;  %s3395_s9 = int_to_ptr.vmem [resolvable:$false] %s3394_s9 }
  0x9f   : > { %s3396_s3 = scalar_lea.vmem %s3395_s9, 512  ;;  %p3397_p5 = scmp.lt.s32.totalorder %s3807_s1, %s3395_s9 }
  0xa0   : > { %p3392_p1 = pnand %p3390_p8, %p4325_p10  ;;  %p3398_p9 = scmp.lt.s32.totalorder %s3396_s3, %s3389_s20 }
  0xa2   : > { %p3393_p13 = pneg %p3392_p1  ;;  %p3399_p6 = por %p3398_p9, %p3397_p5 }
  0xa4   : > { %p3400_p4 = pnand %p3399_p6, %p3393_p13 }
  0xa6   : > { %3403 = shalt.err (!%p3400_p4)
}
  0xa7   : > { %3142 = dma.hbm_to_vmem [thread:$0]  (!%p4326_p7), %s3775_s8, 256, %s3807_s1, %s3705_s17, %s4319_s19, %s4319_s19, %s4318_s28  }
  0xa8   : > { %p4327_p10 = scmp.ne.s32.totalorder %s4308_s13, 0 }
  0xa9   : > { %s3837_s18 = sand.u32 (!%p4327_p10), 1, %s3478_s25   ;;  %p4328_p3 = scmp.ne.s32.totalorder (!%p4327_p10), %s4304_s10, 0 }
  0xaa   : > { %348 = sbr.rel (%p4327_p10) target bundleno = 1732 (0x6c4), region = 48  ;;  %s3840_s22 = sshll.u32 (!%p4327_p10), %s3837_s18, 4 }
  0xab   : > { %s351_s24 = scalar_lea.sflag (!%p4327_p10), [#allocation3], %s3837_s18  ;;  %s354_s7 = scalar_lea.vmem (!%p4327_p10), [#allocation2], %s3840_s22 }
  0xb1   : > { %3457 = dma.done.wait (%p4328_p3), %s351_s24, 256  }
  0xb2   : > { %3459 = vsyncadd (%p4328_p3), %s351_s24, 4294967040  ;;  %s359_s13 = sand.u32 1, %s3586_s30   ;;  %s363_s28 = scalar_lea.vmem [#allocation5], %s3840_s22 }
  0xb3   : > { %s360_s17 = scalar_lea.sflag [#allocation6], %s359_s13 }
  0xb4   : > { %3461 = dma.done.wait (%p4328_p3), %s360_s17, 512  }
  0xb5   : > { %3463 = vsyncadd (%p4328_p3), %s360_s17, 4294966784  ;;  %s372_s19 = scalar_lea.vmem [#allocation7], %s3840_s22  ;;  %p4329_p7 = scmp.eq.s32.totalorder %s3586_s30, 0 }
  0xb7   : > { %3465 = dma.done.wait (%p4329_p7), [#allocation9], 1024   ;;  %p4330_p12 = pmov %p4329_p7 }
  0xb8   : > { %vm438_vm0 = vcmask 261120   ;;  %v3859_v0 = vld [vmem:[#allocation8] sm:$0xff]  ;;  %v3861_v1 = vld [vmem:[#allocation8 + $0x8] sm:$0xff]  ;;  %v3863_v2 = vld [vmem:[#allocation8 + $0x10] sm:$0xff]  ;;  %s3503_s8 = smov 112   ;;  %s3504_s5 = smov 120   ;;  %v645_v16 = vlaneseq }
  0xb9   : > { %3467 = vsyncadd (%p4330_p12), [#allocation9], 4294966272  ;;  %v3216_v3 = vpack.i.bf16 %v3861_v1, %v3859_v0  ;;  %v3046_v4 = vpack.c.bf16 %v3861_v1, %v3859_v0  ;;  %v3869_v5 = vld [vmem:[#allocation8 + $0x18] sm:$0xff]  ;;  %v423_v6 = vld [vmem:[%s354_s7] sm:$0xff]  ;;  %s3505_s1 = smov 104   ;;  %s3506_s29 = smov 96  }
  0xba   : > { %v3050_v7 = vpack.c.bf16 %v3869_v5, %v3863_v2  ;;  %2965 = vmatprep.mubr.msk.f32.mxu0 %vm438_vm0, %v423_v6  ;;  %v424_v8 = vld [vmem:[%s354_s7 + $0x8] sm:$0xff]  ;;  %v3878_v9 = vld [vmem:[%s4269_s4] ss:$0 sm:$0xff]  ;;  %v3507_v14 = vmov 1983009808   ;;  %v646_v20 = vshrl.u32 %v645_v16, 7  ;;  %v3221_v33 = vpack.i.bf16 %v3869_v5, %v3863_v2 }
  0xbb   : > { %3047 = vmatprep.subr.bf16.mxu0 %v3046_v4  ;;  %v643_v15 = vunpack.c.l.s4 %v3507_v14  ;;  %v3508_v21 = vmov 1934713408   ;;  %s3509_s14 = smov 64   ;;  %vm1500_vm1 = vcmask 64512   ;;  %v425_v6 = vld [vmem:[%s363_s28] sm:$0xff]  ;;  %vm1849_vm3 = vcmask 130048  }
  0xbc   : > { %3049 = vmatpush3.bf16.msra.mxu0 %v3046_v4  ;;  %v675_v22 = vunpack.c.l.s4 %v3508_v21  ;;  %2976 = vmatprep.mubr.msk.f32.mxu1 %vm438_vm0, %v425_v6  ;;  %vm4013_vm2 = vmpackc.low %vm1500_vm1, %vm1500_vm1  ;;  %s3510_s21 = smov 16   ;;  %s3511_s16 = smov 8   ;;  %vm2562_vm4 = vcmask 195584  }
  0xbd   : > { %3051 = vmatprep.subr.bf16.mxu0 %v3050_v7  ;;  %v644_v19 = vunpack.c.0.s8 %v643_v15  ;;  %s3512_s12 = smov 24   ;;  %s2906_s23 = sshll.u32 %s3486_s27, 8 }
  0xbe   : > { %v676_v28 = vunpack.c.0.s8 %v675_v22  ;;  %s420_s9 = scalar_lea.vmem [#allocation11], %s3840_s22  ;;  %s4333_s13 = sld [smem:[#allocation25_spill]] }
  0xbf   : > { %v3893_v25 = vsub.s32 %v644_v19, %v646_v20  ;;  %s2679_s3 = sshll.u32 %s420_s9, 4  ;;  %s2664_s27 = scalar_lea.sflag [#allocation4], %s3837_s18  ;;  %s4213_s3 = int_to_ptr.vmem [resolvable:$true] %s2679_s3 }
  0xc0   : > { %3053 = vmatpush3.bf16.msra.mxu0 %v3050_v7  ;;  %v3900_v40 = vsub.s32 %v676_v28, %v646_v20  ;;  %s3404_s22 = scalar_lea.vmem %s4213_s3, 256  ;;  %p4334_p11 = scmp.ne.s32.totalorder %s4305_s11, 0 }
  0xc1   : > { %p3405_p2 = scmp.ne.s32.totalorder %s4213_s3, %s3404_s22 }
  0xc3   : > { %2966 = vmatmul.mubr.msk.f32.vlgmr.msra.gmra.mrb[0].mxu0 %vm438_vm0, %v424_v8  ;;  %p3406_p0 = pnand %p3405_p2, %p4334_p11 }
  0xc4   : > { %s4211_s17 = scalar_lea.hbm %s4333_s13, %s2906_s23 }
  0xc5   : > { %p3407_p8 = pneg %p3406_p0 }
 0x196   : > { %v2967_v10 = vpop.f32.mrb[0].mxu0 }
 0x197   : > { %v517_v11 = vadd.f32 %v2967_v10, %v3878_v9  ;;  %v511_v12 = vpop.f32.mrb[1].mxu0 }
 0x198   : > { %v512_v13 = vadd.f32 %v3878_v9, %v511_v12 }
 0x199   : > { %630 = vrot.lane.b32.xlu1 %v517_v11, %s3503_s8  ;;  %624 = vrot.lane.b32.xlu0 %v517_v11, %s3504_s5 }
 0x19d   : > { %628 = vrot.lane.b32.xlu1 %v512_v13, %s3503_s8  ;;  %622 = vrot.lane.b32.xlu0 %v512_v13, %s3504_s5 }
 0x1a1   : > { %636 = vrot.lane.b32.xlu1 %v517_v11, %s3505_s1  ;;  %634 = vrot.lane.b32.xlu0 %v512_v13, %s3505_s1 }
 0x1a5   : > { %914 = vrot.lane.b32.xlu1 %v517_v11, %s3506_s29  ;;  %912 = vrot.lane.b32.xlu0 %v512_v13, %s3506_s29 }
 0x20b   : > { %v631_v17 = vpop.permute.xlu1 %630  ;;  %v625_v18 = vpop.permute.xlu0 %624 }
 0x20c   : > { %918 = vrot.lane.b32.xlu1 %v625_v18, %s3506_s29  ;;  %v708_v26 = vcombine.low %v517_v11, %v631_v17  ;;  %v709_v27 = vcombine.high %v517_v11, %v631_v17 }
 0x20e   : > { %v716_v38 = vrot.slane %v708_v26, %v3893_v25  ;;  %v723_v39 = vrot.slane %v709_v27, %v3893_v25 }
 0x20f   : > { %v629_v23 = vpop.permute.xlu1 %628  ;;  %v623_v24 = vpop.permute.xlu0 %622 }
 0x210   : > { %922 = vrot.lane.b32.xlu1 %v631_v17, %s3506_s29  ;;  %916 = vrot.lane.b32.xlu0 %v623_v24, %s3506_s29  ;;  %v640_v29 = vcombine.low %v512_v13, %v629_v23  ;;  %v641_v30 = vcombine.high %v512_v13, %v629_v23 }
 0x212   : > { %v648_v45 = vrot.slane %v640_v29, %v3893_v25  ;;  %v655_v46 = vrot.slane %v641_v30, %v3893_v25 }
 0x213   : > { %v637_v31 = vpop.permute.xlu1 %636  ;;  %v635_v32 = vpop.permute.xlu0 %634 }
 0x214   : > { %v724_v34 = vcombine.low %v625_v18, %v637_v31  ;;  %v725_v35 = vcombine.high %v625_v18, %v637_v31  ;;  %v656_v36 = vcombine.low %v623_v24, %v635_v32  ;;  %v657_v37 = vcombine.high %v623_v24, %v635_v32  ;;  %926 = vrot.lane.b32.xlu1 %v637_v31, %s3506_s29 }
 0x215   : > { %920 = vrot.lane.b32.xlu0 %v629_v23, %s3506_s29 }
 0x216   : > { %v732_v41 = vrot.slane %v724_v34, %v3893_v25  ;;  %v739_v42 = vrot.slane %v725_v35, %v3893_v25  ;;  %v664_v43 = vrot.slane %v656_v36, %v3893_v25  ;;  %v671_v44 = vrot.slane %v657_v37, %v3893_v25 }
 0x218   : > { %v740_v47 = vcombine.low %v716_v38, %v732_v41  ;;  %v741_v48 = vcombine.high %v716_v38, %v732_v41  ;;  %v756_v49 = vcombine.low %v723_v39, %v739_v42  ;;  %v757_v50 = vcombine.high %v723_v39, %v739_v42  ;;  %3222 = vrot.lane.b32.xlu1 %v3221_v33, %s3509_s14  ;;  %v915_v42 = vpop.permute.xlu1 %914 }
 0x219   : > { %v672_v51 = vcombine.low %v648_v45, %v664_v43  ;;  %v673_v52 = vcombine.high %v648_v45, %v664_v43  ;;  %v688_v53 = vcombine.low %v655_v46, %v671_v44  ;;  %v689_v54 = vcombine.high %v655_v46, %v671_v44  ;;  %924 = vrot.lane.b32.xlu0 %v635_v32, %s3506_s29  ;;  %v913_v43 = vpop.permute.xlu0 %912 }
 0x21a   : > { %v748_v55 = vrot.slane %v740_v47, %v3900_v40  ;;  %v755_v56 = vrot.slane %v741_v48, %v3900_v40  ;;  %v764_v57 = vrot.slane %v756_v49, %v3900_v40  ;;  %v771_v58 = vrot.slane %v757_v50, %v3900_v40 }
 0x21b   : > { %v680_v59 = vrot.slane %v672_v51, %v3900_v40  ;;  %v687_v60 = vrot.slane %v673_v52, %v3900_v40  ;;  %v696_v61 = vrot.slane %v688_v53, %v3900_v40  ;;  %v703_v62 = vrot.slane %v689_v54, %v3900_v40 }
 0x21c   : > { %v844_v63 = vcombine.low %v748_v55, %v755_v56  ;;  %v2857_v2 = vcombine.high %v748_v55, %v755_v56  ;;  %v860_v4 = vcombine.low %v764_v57, %v771_v58  ;;  %v2858_v5 = vcombine.high %v764_v57, %v771_v58 }
 0x21d   : > { %v776_v7 = vcombine.low %v680_v59, %v687_v60  ;;  %v2855_v8 = vcombine.high %v680_v59, %v687_v60  ;;  %v792_v10 = vcombine.low %v696_v61, %v703_v62  ;;  %v2856_v11 = vcombine.high %v696_v61, %v703_v62  ;;  %3217 = vrot.lane.b32.xlu0 %v3216_v3, %s3509_s14 }
 0x21e   : > { %v851_v12 = vrot.slane %v844_v63, %v3893_v25  ;;  %v859_v13 = vrot.slane %v2857_v2, %v3893_v25  ;;  %v867_v14 = vrot.slane %v860_v4, %v3893_v25  ;;  %v875_v15 = vrot.slane %v2858_v5, %v3893_v25 }
 0x21f   : > { %v783_v16 = vrot.slane %v776_v7, %v3893_v25  ;;  %v791_v17 = vrot.slane %v2855_v8, %v3893_v25  ;;  %v799_v18 = vrot.slane %v792_v10, %v3893_v25  ;;  %v807_v19 = vrot.slane %v2856_v11, %v3893_v25 }
 0x220   : > { %v876_v0 = vcombine.low %v851_v12, %v859_v13  ;;  %v877_v1 = vcombine.high %v851_v12, %v859_v13  ;;  %v892_v3 = vcombine.low %v867_v14, %v875_v15  ;;  %v893_v20 = vcombine.high %v867_v14, %v875_v15 }
 0x221   : > { %v808_v21 = vcombine.low %v783_v16, %v791_v17  ;;  %v824_v22 = vcombine.low %v799_v18, %v807_v19  ;;  %v809_v23 = vcombine.high %v783_v16, %v791_v17  ;;  %v825_v24 = vcombine.high %v799_v18, %v807_v19  ;;  %536 = vrot.lane.b32.xlu0 %v3878_v9, %s3509_s14 }
 0x222   : > { %v3937_v26 = vrot.slane %v876_v0, %v3900_v40  ;;  %v3940_v27 = vrot.slane %v892_v3, %v3900_v40  ;;  %v3943_v28 = vrot.slane %v877_v1, %v3900_v40  ;;  %v3946_v29 = vrot.slane %v893_v20, %v3900_v40 }
 0x223   : > { %v3949_v30 = vrot.slane %v808_v21, %v3900_v40  ;;  %v3952_v31 = vrot.slane %v824_v22, %v3900_v40  ;;  %v3955_v9 = vrot.slane %v809_v23, %v3900_v40  ;;  %v3958_v32 = vrot.slane %v825_v24, %v3900_v40 }
 0x224   : > { %v908_v33 = vcombine.low %v3937_v26, %v3940_v27  ;;  %v909_v34 = vcombine.high %v3937_v26, %v3940_v27  ;;  %v910_v35 = vcombine.low %v3943_v28, %v3946_v29  ;;  %v911_v36 = vcombine.high %v3943_v28, %v3946_v29 }
 0x225   : > { %v840_v37 = vcombine.low %v3949_v30, %v3952_v31  ;;  %v841_v38 = vcombine.high %v3949_v30, %v3952_v31  ;;  %v842_v39 = vcombine.low %v3955_v9, %v3958_v32  ;;  %v843_v41 = vcombine.high %v3955_v9, %v3958_v32 }
 0x227   : > { %2983 = vmatprep.mubr.msk.f32.mxu0 %vm1500_vm1, %v840_v37 }
 0x27e   : > { %v919_v44 = vpop.permute.xlu1 %918 }
 0x282   : > { %v923_v45 = vpop.permute.xlu1 %922  ;;  %v917_v46 = vpop.permute.xlu0 %916 }
 0x283   : > { %v1004_v47 = vcombine.low %v915_v42, %v923_v45  ;;  %v1005_v48 = vcombine.high %v915_v42, %v923_v45 }
 0x285   : > { %v1012_v55 = vrot.slane %v1004_v47, %v3893_v25  ;;  %v1019_v56 = vrot.slane %v1005_v48, %v3893_v25 }
 0x286   : > { %v927_v49 = vpop.permute.xlu1 %926 }
 0x287   : > { %v1020_v50 = vcombine.low %v919_v44, %v927_v49  ;;  %v1021_v51 = vcombine.high %v919_v44, %v927_v49  ;;  %v921_v52 = vpop.permute.xlu0 %920 }
 0x288   : > { %v936_v53 = vcombine.low %v913_v43, %v921_v52  ;;  %v937_v54 = vcombine.high %v913_v43, %v921_v52 }
 0x289   : > { %v1028_v57 = vrot.slane %v1020_v50, %v3893_v25  ;;  %v1035_v58 = vrot.slane %v1021_v51, %v3893_v25 }
 0x28a   : > { %v3223_v2 = vpop.permute.xlu1 %3222  ;;  %v944_v4 = vrot.slane %v936_v53, %v3893_v25  ;;  %v951_v5 = vrot.slane %v937_v54, %v3893_v25 }
 0x28b   : > { %v1036_v59 = vcombine.low %v1012_v55, %v1028_v57  ;;  %v1037_v60 = vcombine.high %v1012_v55, %v1028_v57  ;;  %v1052_v61 = vcombine.low %v1019_v56, %v1035_v58  ;;  %v1053_v62 = vcombine.high %v1019_v56, %v1035_v58  ;;  %v925_v63 = vpop.permute.xlu0 %924 }
 0x28c   : > { %v952_v6 = vcombine.low %v917_v46, %v925_v63  ;;  %v953_v7 = vcombine.high %v917_v46, %v925_v63  ;;  %v3225_v15 = vunpack.i.h.bf16 %v3223_v2  ;;  %v3224_v16 = vunpack.i.l.bf16 %v3223_v2 }
 0x28d   : > { %v1044_v8 = vrot.slane %v1036_v59, %v3900_v40  ;;  %v1051_v10 = vrot.slane %v1037_v60, %v3900_v40  ;;  %v1060_v11 = vrot.slane %v1052_v61, %v3900_v40  ;;  %v1067_v12 = vrot.slane %v1053_v62, %v3900_v40 }
 0x28e   : > { %v960_v13 = vrot.slane %v952_v6, %v3893_v25  ;;  %v967_v14 = vrot.slane %v953_v7, %v3893_v25  ;;  %v3058_v55 = vpack.c.bf16 %v3225_v15, %v3224_v16  ;;  %v426_v16 = vld [vmem:[%s363_s28 + $0x8] sm:$0xff]  ;;  %s3513_s28 = smov [#allocation11]  }
 0x28f   : > { %v1140_v17 = vcombine.low %v1044_v8, %v1051_v10  ;;  %v2861_v18 = vcombine.high %v1044_v8, %v1051_v10  ;;  %v1156_v19 = vcombine.low %v1060_v11, %v1067_v12  ;;  %v2862_v0 = vcombine.high %v1060_v11, %v1067_v12  ;;  %v3218_v22 = vpop.permute.xlu0 %3217 }
 0x290   : > { %v968_v1 = vcombine.low %v944_v4, %v960_v13  ;;  %v969_v3 = vcombine.high %v944_v4, %v960_v13  ;;  %v984_v20 = vcombine.low %v951_v5, %v967_v14  ;;  %v985_v21 = vcombine.high %v951_v5, %v967_v14 }
 0x291   : > { %v1147_v23 = vrot.slane %v1140_v17, %v3893_v25  ;;  %v1155_v24 = vrot.slane %v2861_v18, %v3893_v25  ;;  %v1163_v37 = vrot.slane %v1156_v19, %v3893_v25  ;;  %v1171_v42 = vrot.slane %v2862_v0, %v3893_v25 }
 0x292   : > { %v976_v43 = vrot.slane %v968_v1, %v3900_v40  ;;  %v983_v44 = vrot.slane %v969_v3, %v3900_v40  ;;  %v992_v45 = vrot.slane %v984_v20, %v3900_v40  ;;  %v999_v46 = vrot.slane %v985_v21, %v3900_v40 }
 0x293   : > { %v3220_v47 = vunpack.i.h.bf16 %v3218_v22  ;;  %v3219_v48 = vunpack.i.l.bf16 %v3218_v22  ;;  %v1172_v49 = vcombine.low %v1147_v23, %v1155_v24  ;;  %v1188_v50 = vcombine.low %v1163_v37, %v1171_v42  ;;  %v537_v26 = vpop.permute.xlu0 %536 }
 0x294   : > { %v1072_v51 = vcombine.low %v976_v43, %v983_v44  ;;  %v2859_v52 = vcombine.high %v976_v43, %v983_v44  ;;  %v1088_v53 = vcombine.low %v992_v45, %v999_v46  ;;  %v2860_v54 = vcombine.high %v992_v45, %v999_v46 }
 0x295   : > { %v3054_v56 = vpack.c.bf16 %v3220_v47, %v3219_v48  ;;  %v1173_v57 = vcombine.high %v1147_v23, %v1155_v24  ;;  %v1180_v62 = vrot.slane %v1172_v49, %v3900_v40  ;;  %v1196_v63 = vrot.slane %v1188_v50, %v3900_v40 }
 0x296   : > { %v1079_v58 = vrot.slane %v1072_v51, %v3893_v25  ;;  %v1087_v59 = vrot.slane %v2859_v52, %v3893_v25  ;;  %v1095_v60 = vrot.slane %v1088_v53, %v3893_v25  ;;  %v1103_v61 = vrot.slane %v2860_v54, %v3893_v25 }
 0x297   : > { %3055 = vmatprep.subr.bf16.mxu1 %v3054_v56  ;;  %v1189_v2 = vcombine.high %v1163_v37, %v1171_v42  ;;  %v1187_v8 = vrot.slane %v1173_v57, %v3900_v40  ;;  %v1204_v15 = vcombine.low %v1180_v62, %v1196_v63  ;;  %v1205_v19 = vcombine.high %v1180_v62, %v1196_v63 }
 0x298   : > { %3057 = vmatpush3.bf16.msra.mxu1 %v3054_v56  ;;  %v1104_v4 = vcombine.low %v1079_v58, %v1087_v59  ;;  %v1120_v5 = vcombine.low %v1095_v60, %v1103_v61  ;;  %v1105_v6 = vcombine.high %v1079_v58, %v1087_v59  ;;  %v1121_v7 = vcombine.high %v1095_v60, %v1103_v61 }
 0x299   : > { %3059 = vmatprep.subr.bf16.mxu1 %v3058_v55  ;;  %v1203_v10 = vrot.slane %v1189_v2, %v3900_v40 }
 0x29a   : > { %v1112_v11 = vrot.slane %v1104_v4, %v3900_v40  ;;  %v1128_v12 = vrot.slane %v1120_v5, %v3900_v40  ;;  %v1119_v13 = vrot.slane %v1105_v6, %v3900_v40  ;;  %v1135_v14 = vrot.slane %v1121_v7, %v3900_v40 }
 0x29b   : > { %v1206_v21 = vcombine.low %v1187_v8, %v1203_v10  ;;  %v1207_v24 = vcombine.high %v1187_v8, %v1203_v10 }
 0x29c   : > { %3061 = vmatpush3.bf16.msra.mxu1 %v3058_v55  ;;  %v1136_v17 = vcombine.low %v1112_v11, %v1128_v12  ;;  %v1137_v18 = vcombine.high %v1112_v11, %v1128_v12  ;;  %v1138_v0 = vcombine.low %v1119_v13, %v1135_v14  ;;  %v1139_v23 = vcombine.high %v1119_v13, %v1135_v14 }
 0x29e   : > { %v3062_v3 = vpack.c.bf16 %v1204_v15, %v1136_v17  ;;  %v3068_v20 = vpack.c.bf16 %v1205_v19, %v1137_v18  ;;  %v3074_v22 = vpack.c.bf16 %v1206_v21, %v1138_v0  ;;  %v3080_v37 = vpack.c.bf16 %v1207_v24, %v1139_v23 }
 0x29f   : > { %2977 = vmatmul.mubr.msk.f32.vlgmr.msra.gmra.mrb[0].mxu1 %vm438_vm0, %v426_v16 }
 0x2a0   : > { %2990 = vmatprep.mubr.msk.f32.mxu1 %vm1500_vm1, %v841_v38  ;;  %3064 = vmatprep.subr.msk.bf16.mxu0 %vm4013_vm2, %v3062_v3 }
 0x2a1   : > { %3070 = vmatprep.subr.msk.bf16.mxu1 %vm4013_vm2, %v3068_v20  ;;  %3067 = vmatpush3.bf16.xpose.msk.msra.mxu0 %vm4013_vm2, %v3062_v3 }
 0x2a2   : > { %3076 = vmatprep.subr.msk.bf16.mxu0 %vm4013_vm2, %v3074_v22 }
 0x2a5   : > { %3073 = vmatpush3.bf16.xpose.msk.msra.mxu1 %vm4013_vm2, %v3068_v20 }
 0x2a6   : > { %3082 = vmatprep.subr.msk.bf16.mxu1 %vm4013_vm2, %v3080_v37 }
 0x2a8   : > { %2984 = vmatmul.mubr.msk.f32.vlgmr.msra.gmra.mrb[2].mxu0 %vm1500_vm1, %v908_v33 }
 0x2a9   : > { %3079 = vmatpush3.bf16.xpose.msk.msra.mxu0 %vm4013_vm2, %v3074_v22  ;;  %2997 = vmatprep.mubr.msk.f32.mxu0 %vm1500_vm1, %v842_v39 }
 0x2ac   : > { %2991 = vmatmul.mubr.msk.f32.vlgmr.msra.gmra.mrb[2].mxu1 %vm1500_vm1, %v909_v34 }
 0x2ad   : > { %3085 = vmatpush3.bf16.xpose.msk.msra.mxu1 %vm4013_vm2, %v3080_v37  ;;  %3004 = vmatprep.mubr.msk.f32.mxu1 %vm1500_vm1, %v843_v41 }
 0x2b0   : > { %2998 = vmatmul.mubr.msk.f32.vlgmr.msra.gmra.mrb[4].mxu0 %vm1500_vm1, %v910_v35 }
 0x2b4   : > { %3005 = vmatmul.mubr.msk.f32.vlgmr.msra.gmra.mrb[4].mxu1 %vm1500_vm1, %v911_v36 }
 0x372   : > { %v2978_v27 = vpop.f32.mrb[0].mxu1 }
 0x373   : > { %v617_v30 = vadd.f32 %v2978_v27, %v537_v26  ;;  %v611_v31 = vpop.f32.mrb[1].mxu1 }
 0x374   : > { %v4064_v9 = vadd.f32 %v611_v31, %v537_v26 }
 0x375   : > { %1218 = vrot.lane.b32.xlu0 %v617_v30, %s3503_s8  ;;  %1212 = vrot.lane.b32.xlu1 %v617_v30, %s3504_s5 }
 0x379   : > { %1216 = vrot.lane.b32.xlu1 %v4064_v9, %s3503_s8  ;;  %1210 = vrot.lane.b32.xlu0 %v4064_v9, %s3504_s5 }
 0x37b   : > { %v2985_v32 = vpop.f32.mrb[2].mxu0 }
 0x37c   : > { %v1579_v28 = vpop.f32.mrb[3].mxu0  ;;  %v1853_v39 = vsel %vm1849_vm3, %v2985_v32, -inf }
 0x37d   : > { %v1850_v42 = vsel %vm1849_vm3, %v1579_v28, -inf }
 0x37f   : > { %v2992_v29 = vpop.f32.mrb[2].mxu1 }
 0x380   : > { %v4070_v33 = vpop.f32.mrb[3].mxu1  ;;  %v1859_v41 = vsel %vm1849_vm3, %v2992_v29, -inf }
 0x381   : > { %v1856_v43 = vsel %vm1849_vm3, %v4070_v33, -inf }
 0x383   : > { %v4072_v34 = vpop.f32.mrb[4].mxu0 }
 0x384   : > { %v4074_v35 = vpop.f32.mrb[5].mxu0  ;;  %v1865_v45 = vsel %vm1849_vm3, %v4072_v34, -inf }
 0x385   : > { %v1862_v46 = vsel %vm1849_vm3, %v4074_v35, -inf }
 0x387   : > { %v4076_v36 = vpop.f32.mrb[4].mxu1 }
 0x388   : > { %v4078_v38 = vpop.f32.mrb[5].mxu1  ;;  %v1871_v47 = vsel %vm1849_vm3, %v4076_v36, -inf }
 0x389   : > { %v1868_v44 = vsel %vm1849_vm3, %v4078_v38, -inf }
 0x398   : > { %1854 = vmax.xlane.f32.xlu0 %v1853_v39 }
 0x39d   : > { %1860 = vmax.xlane.f32.xlu1 %v1859_v41 }
 0x3a1   : > { %1851 = vmax.xlane.f32.xlu1 %v1850_v42 }
 0x3ae   : > { %1224 = vrot.lane.b32.xlu0 %v617_v30, %s3505_s1 }
 0x3b2   : > { %1222 = vrot.lane.b32.xlu1 %v4064_v9, %s3505_s1 }
 0x3cd   : > { %1857 = vmax.xlane.f32.xlu0 %v1856_v43 }
 0x3d1   : > { %1869 = vmax.xlane.f32.xlu0 %v1868_v44 }
 0x3d5   : > { %1866 = vmax.xlane.f32.xlu0 %v1865_v45 }
 0x3d6   : > { %1863 = vmax.xlane.f32.xlu1 %v1862_v46 }
 0x3da   : > { %1872 = vmax.xlane.f32.xlu1 %v1871_v47 }
 0x3e7   : > { %v1219_v48 = vpop.permute.xlu0 %1218  ;;  %v1213_v49 = vpop.permute.xlu1 %1212 }
 0x3e8   : > { %v1296_v54 = vcombine.low %v617_v30, %v1219_v48  ;;  %v1297_v55 = vcombine.high %v617_v30, %v1219_v48 }
 0x3ea   : > { %v1304_v62 = vrot.slane %v1296_v54, %v3893_v25  ;;  %v1311_v63 = vrot.slane %v1297_v55, %v3893_v25 }
 0x3eb   : > { %v1211_v50 = vpop.permute.xlu0 %1210  ;;  %v1217_v52 = vpop.permute.xlu1 %1216 }
 0x3ec   : > { %v1228_v12 = vcombine.low %v4064_v9, %v1217_v52  ;;  %v1229_v18 = vcombine.high %v4064_v9, %v1217_v52 }
 0x3ee   : > { %v1236_v37 = vrot.slane %v1228_v12, %v3893_v25  ;;  %v1243_v30 = vrot.slane %v1229_v18, %v3893_v25 }
 0x425   : > { %v1855_v51 = vpop.xlane.xlu0 %1854 }
 0x426   : > { %v1875_v53 = vsub.f32 %v2985_v32, %v1855_v51 }
 0x428   : > { %v1884_v56 = vmul.f32 1.442695, %v1875_v53 }
 0x429   : > { %v1225_v57 = vpop.permute.xlu0 %1224 }
 0x42a   : > { %3226 = vpow2.f32 %v1884_v56  ;;  %v1312_v58 = vcombine.low %v1213_v49, %v1225_v57  ;;  %v1313_v59 = vcombine.high %v1213_v49, %v1225_v57  ;;  %v1861_v60 = vpop.xlane.xlu1 %1860 }
 0x42b   : > { %v1877_v61 = vsub.f32 %v2992_v29, %v1861_v60 }
 0x42c   : > { %v1320_v2 = vrot.slane %v1312_v58, %v3893_v25  ;;  %v1327_v4 = vrot.slane %v1313_v59, %v3893_v25 }
 0x42d   : > { %v1888_v5 = vmul.f32 1.442695, %v1877_v61 }
 0x42e   : > { %v1328_v6 = vcombine.low %v1304_v62, %v1320_v2  ;;  %v1329_v7 = vcombine.high %v1304_v62, %v1320_v2  ;;  %v1344_v8 = vcombine.low %v1311_v63, %v1327_v4  ;;  %v1345_v10 = vcombine.high %v1311_v63, %v1327_v4  ;;  %v1852_v11 = vpop.xlane.xlu1 %1851 }
 0x42f   : > { %3228 = vpow2.f32 %v1888_v5  ;;  %v1874_v13 = vsub.f32 %v1579_v28, %v1852_v11 }
 0x430   : > { %v1336_v14 = vrot.slane %v1328_v6, %v3900_v40  ;;  %v1343_v15 = vrot.slane %v1329_v7, %v3900_v40  ;;  %v1352_v16 = vrot.slane %v1344_v8, %v3900_v40  ;;  %v1359_v17 = vrot.slane %v1345_v10, %v3900_v40 }
 0x431   : > { %v1882_v19 = vmul.f32 1.442695, %v1874_v13 }
 0x432   : > { %v1432_v0 = vcombine.low %v1336_v14, %v1343_v15  ;;  %v2865_v1 = vcombine.high %v1336_v14, %v1343_v15  ;;  %v1448_v3 = vcombine.low %v1352_v16, %v1359_v17  ;;  %v2866_v20 = vcombine.high %v1352_v16, %v1359_v17  ;;  %v1223_v21 = vpop.permute.xlu1 %1222 }
 0x433   : > { %3230 = vpow2.f32 %v1882_v19  ;;  %v1244_v22 = vcombine.low %v1211_v50, %v1223_v21  ;;  %v1245_v23 = vcombine.high %v1211_v50, %v1223_v21 }
 0x434   : > { %v4106_v24 = vpop.eup %3226  ;;  %v1439_v26 = vrot.slane %v1432_v0, %v3893_v25  ;;  %v1447_v27 = vrot.slane %v2865_v1, %v3893_v25  ;;  %v1455_v28 = vrot.slane %v1448_v3, %v3893_v25  ;;  %v1463_v29 = vrot.slane %v2866_v20, %v3893_v25 }
 0x435   : > { %v1252_v31 = vrot.slane %v1244_v22, %v3893_v25  ;;  %v1259_v9 = vrot.slane %v1245_v23, %v3893_v25  ;;  %v1901_v32 = vsel %vm1849_vm3, %v4106_v24, 0.0 }
 0x436   : > { %1902 = vadd.xlane.f32.xlu0 %v1901_v32  ;;  %v1464_v44 = vcombine.low %v1439_v26, %v1447_v27  ;;  %v1480_v51 = vcombine.low %v1455_v28, %v1463_v29  ;;  %v1465_v52 = vcombine.high %v1439_v26, %v1447_v27  ;;  %v1481_v53 = vcombine.high %v1455_v28, %v1463_v29 }
 0x437   : > { %v1260_v39 = vcombine.low %v1236_v37, %v1252_v31  ;;  %v1261_v41 = vcombine.high %v1236_v37, %v1252_v31  ;;  %v1276_v42 = vcombine.low %v1243_v30, %v1259_v9  ;;  %v1277_v43 = vcombine.high %v1243_v30, %v1259_v9 }
 0x438   : > { %v1472_v58 = vrot.slane %v1464_v44, %v3900_v40  ;;  %v1488_v4 = vrot.slane %v1480_v51, %v3900_v40  ;;  %v1479_v5 = vrot.slane %v1465_v52, %v3900_v40  ;;  %v1495_v6 = vrot.slane %v1481_v53, %v3900_v40 }
 0x439   : > { %v4118_v45 = vpop.eup %3228  ;;  %v1268_v46 = vrot.slane %v1260_v39, %v3900_v40  ;;  %v1275_v47 = vrot.slane %v1261_v41, %v3900_v40  ;;  %v1284_v48 = vrot.slane %v1276_v42, %v3900_v40  ;;  %v1291_v49 = vrot.slane %v1277_v43, %v3900_v40 }
 0x43a   : > { %v1907_v50 = vsel %vm1849_vm3, %v4118_v45, 0.0  ;;  %v1496_v16 = vcombine.low %v1472_v58, %v1488_v4  ;;  %v1498_v19 = vcombine.low %v1479_v5, %v1495_v6  ;;  %v1497_v20 = vcombine.high %v1472_v58, %v1488_v4 }
 0x43b   : > { %v1364_v54 = vcombine.low %v1268_v46, %v1275_v47  ;;  %v2863_v55 = vcombine.high %v1268_v46, %v1275_v47  ;;  %v1380_v56 = vcombine.low %v1284_v48, %v1291_v49  ;;  %v2864_v57 = vcombine.high %v1284_v48, %v1291_v49  ;;  %1908 = vadd.xlane.f32.xlu1 %v1907_v50 }
 0x43c   : > { %v1499_v23 = vcombine.high %v1479_v5, %v1495_v6 }
 0x43d   : > { %v3231_v59 = vpop.eup %3230  ;;  %v1371_v60 = vrot.slane %v1364_v54, %v3893_v25  ;;  %v1379_v61 = vrot.slane %v2863_v55, %v3893_v25  ;;  %v1387_v62 = vrot.slane %v1380_v56, %v3893_v25  ;;  %v1395_v63 = vrot.slane %v2864_v57, %v3893_v25 }
 0x43e   : > { %3011 = vmatprep.mubr.msk.f32.mxu1 %vm1849_vm3, %v3231_v59  ;;  %v1898_v2 = vsel %vm1849_vm3, %v3231_v59, 0.0 }
 0x43f   : > { %1899 = vadd.xlane.f32.xlu0 %v1898_v2  ;;  %v1396_v7 = vcombine.low %v1371_v60, %v1379_v61  ;;  %v1412_v8 = vcombine.low %v1387_v62, %v1395_v63  ;;  %v1397_v10 = vcombine.high %v1371_v60, %v1379_v61  ;;  %v1413_v11 = vcombine.high %v1387_v62, %v1395_v63 }
 0x441   : > { %v1404_v12 = vrot.slane %v1396_v7, %v3900_v40  ;;  %v1420_v13 = vrot.slane %v1412_v8, %v3900_v40  ;;  %v1411_v14 = vrot.slane %v1397_v10, %v3900_v40  ;;  %v1427_v15 = vrot.slane %v1413_v11, %v3900_v40 }
 0x443   : > { %v1428_v17 = vcombine.low %v1404_v12, %v1420_v13  ;;  %v1430_v18 = vcombine.low %v1411_v14, %v1427_v15  ;;  %v1429_v0 = vcombine.high %v1404_v12, %v1420_v13  ;;  %v1431_v22 = vcombine.high %v1411_v14, %v1427_v15 }
 0x445   : > { %v3086_v1 = vpack.c.bf16 %v1496_v16, %v1428_v17  ;;  %v3094_v3 = vpack.c.bf16 %v1498_v19, %v1430_v18  ;;  %v3090_v21 = vpack.c.bf16 %v1497_v20, %v1429_v0  ;;  %v3098_v37 = vpack.c.bf16 %v1499_v23, %v1431_v22 }
 0x447   : > { %3087 = vmatprep.subr.bf16.mxu1 %v3086_v1  ;;  %3095 = vmatprep.subr.bf16.mxu0 %v3094_v3 }
 0x448   : > { %3089 = vmatpush3.bf16.msra.mxu1 %v3086_v1  ;;  %3097 = vmatpush3.bf16.msra.mxu0 %v3094_v3 }
 0x449   : > { %3091 = vmatprep.subr.bf16.mxu1 %v3090_v21 }
 0x44b   : > { %3012 = vmatmul.mubr.msk.f32.vlgmr.msra.gmra.mrb[6].mxu1 %vm1849_vm3, %v4106_v24 }
 0x44c   : > { %3093 = vmatpush3.bf16.msra.mxu1 %v3090_v21 }
 0x44d   : > { %3099 = vmatprep.subr.bf16.mxu1 %v3098_v37 }
 0x45a   : > { %v1858_v26 = vpop.xlane.xlu0 %1857 }
 0x45b   : > { %v1876_v27 = vsub.f32 %v4070_v33, %v1858_v26 }
 0x45d   : > { %v1886_v30 = vmul.f32 1.442695, %v1876_v27 }
 0x45e   : > { %v1870_v31 = vpop.xlane.xlu0 %1869 }
 0x45f   : > { %3232 = vpow2.f32 %v1886_v30  ;;  %v1880_v9 = vsub.f32 %v4078_v38, %v1870_v31 }
 0x461   : > { %v1894_v32 = vmul.f32 1.442695, %v1880_v9 }
 0x462   : > { %v1867_v28 = vpop.xlane.xlu0 %1866 }
 0x463   : > { %3234 = vpow2.f32 %v1894_v32  ;;  %v1879_v29 = vsub.f32 %v4072_v34, %v1867_v28  ;;  %v1864_v39 = vpop.xlane.xlu1 %1863 }
 0x464   : > { %v1878_v41 = vsub.f32 %v4074_v35, %v1864_v39 }
 0x465   : > { %v1892_v24 = vmul.f32 1.442695, %v1879_v29 }
 0x466   : > { %v1890_v42 = vmul.f32 1.442695, %v1878_v41 }
 0x467   : > { %v1873_v43 = vpop.xlane.xlu1 %1872 }
 0x468   : > { %3236 = vpow2.f32 %v1890_v42  ;;  %v1881_v44 = vsub.f32 %v4076_v36, %v1873_v43 }
 0x469   : > { %v3233_v33 = vpop.eup %3232  ;;  %3238 = vpow2.f32 %v1892_v24 }
 0x46a   : > { %v1896_v46 = vmul.f32 1.442695, %v1881_v44  ;;  %3018 = vmatprep.mubr.msk.f32.mxu1 %vm1849_vm3, %v3233_v33  ;;  %v1904_v38 = vsel %vm1849_vm3, %v3233_v33, 0.0 }
 0x46b   : > { %3019 = vmatmul.mubr.msk.f32.vlgmr.msra.gmra.mrb[8].mxu1 %vm1849_vm3, %v4118_v45  ;;  %1905 = vadd.xlane.f32.xlu1 %v1904_v38 }
 0x46c   : > { %3240 = vpow2.f32 %v1896_v46  ;;  %3101 = vmatpush3.bf16.msra.mxu1 %v3098_v37 }
 0x46d   : > { %v3235_v34 = vpop.eup %3234 }
 0x46e   : > { %3032 = vmatprep.mubr.msk.f32.mxu1 %vm1849_vm3, %v3235_v34  ;;  %v1916_v35 = vsel %vm1849_vm3, %v3235_v34, 0.0 }
 0x46f   : > { %1917 = vadd.xlane.f32.xlu1 %v1916_v35 }
 0x472   : > { %v3237_v36 = vpop.eup %3236 }
 0x473   : > { %v3239_v47 = vpop.eup %3238  ;;  %3025 = vmatprep.mubr.msk.f32.mxu0 %vm1849_vm3, %v3237_v36  ;;  %v1910_v48 = vsel %vm1849_vm3, %v3237_v36, 0.0 }
 0x474   : > { %1911 = vadd.xlane.f32.xlu0 %v1910_v48  ;;  %3026 = vmatmul.mubr.msk.f32.vlgmr.msra.gmra.mrb[6].mxu0 %vm1849_vm3, %v3239_v47  ;;  %v1913_v50 = vsel %vm1849_vm3, %v3239_v47, 0.0 }
 0x476   : > { %v3241_v49 = vpop.eup %3240 }
 0x477   : > { %3033 = vmatmul.mubr.msk.f32.vlgmr.msra.gmra.mrb[10].mxu1 %vm1849_vm3, %v3241_v49  ;;  %v1919_v45 = vsel %vm1849_vm3, %v3241_v49, 0.0 }
 0x478   : > { %1920 = vadd.xlane.f32.xlu1 %v1919_v45  ;;  %1914 = vadd.xlane.f32.xlu0 %v1913_v50 }
 0x4c3   : > { %v1903_v53 = vpop.xlane.xlu0 %1902 }
 0x4c4   : > { %3242 = vrcp.f32 %v1903_v53 }
 0x4c8   : > { %v1909_v54 = vpop.xlane.xlu1 %1908 }
 0x4c9   : > { %3244 = vrcp.f32 %v1909_v54 }
 0x4cc   : > { %v1900_v55 = vpop.xlane.xlu0 %1899 }
 0x4cd   : > { %3246 = vrcp.f32 %v1900_v55 }
 0x4ce   : > { %v3243_v63 = vpop.eup %3242 }
 0x4d3   : > { %v3245_v2 = vpop.eup %3244 }
 0x4d7   : > { %v3247_v4 = vpop.eup %3246 }
 0x4f8   : > { %v1906_v56 = vpop.xlane.xlu1 %1905 }
 0x4fc   : > { %v1918_v58 = vpop.xlane.xlu1 %1917 }
 0x501   : > { %v1912_v57 = vpop.xlane.xlu0 %1911 }
 0x505   : > { %v1915_v59 = vpop.xlane.xlu0 %1914  ;;  %v1921_v60 = vpop.xlane.xlu1 %1920 }
 0x506   : > { %3248 = vrcp.f32 %v1915_v59 }
 0x507   : > { %3250 = vrcp.f32 %v1912_v57 }
 0x508   : > { %3252 = vrcp.f32 %v1906_v56 }
 0x509   : > { %3254 = vrcp.f32 %v1921_v60 }
 0x50a   : > { %3256 = vrcp.f32 %v1918_v58 }
 0x510   : > { %v3249_v5 = vpop.eup %3248 }
 0x511   : > { %v3251_v7 = vpop.eup %3250 }
 0x512   : > { %v3253_v12 = vpop.eup %3252 }
 0x513   : > { %v3255_v15 = vpop.eup %3254 }
 0x514   : > { %v3257_v19 = vpop.eup %3256 }
 0x51e   : > { %v3013_v51 = vpop.f32.mrb[6].mxu1 }
 0x51f   : > { %v1994_v52 = vpop.f32.mrb[7].mxu1  ;;  %v2255_v8 = vmul.f32 %v3243_v63, %v3013_v51 }
 0x520   : > { %v2254_v13 = vmul.f32 %v3247_v4, %v1994_v52 }
 0x53e   : > { %v3020_v61 = vpop.f32.mrb[8].mxu1 }
 0x53f   : > { %v2075_v62 = vpop.f32.mrb[9].mxu1  ;;  %v2257_v0 = vmul.f32 %v3245_v2, %v3020_v61 }
 0x540   : > { %v2256_v22 = vmul.f32 %v3253_v12, %v2075_v62 }
 0x547   : > { %v3027_v6 = vpop.f32.mrb[6].mxu0 }
 0x548   : > { %v2259_v10 = vmul.f32 %v3249_v5, %v3027_v6  ;;  %v2156_v11 = vpop.f32.mrb[7].mxu0 }
 0x549   : > { %v2258_v14 = vmul.f32 %v3251_v7, %v2156_v11 }
 0x54a   : > { %v2330_v16 = vcombine.low %v2255_v8, %v2259_v10  ;;  %v2331_v17 = vcombine.high %v2255_v8, %v2259_v10  ;;  %v3034_v18 = vpop.f32.mrb[10].mxu1 }
 0x54b   : > { %v2262_v1 = vcombine.low %v2254_v13, %v2258_v14  ;;  %v2263_v3 = vcombine.high %v2254_v13, %v2258_v14  ;;  %v2261_v20 = vmul.f32 %v3255_v15, %v3034_v18  ;;  %v2237_v21 = vpop.f32.mrb[11].mxu1 }
 0x54c   : > { %v2260_v23 = vmul.f32 %v3257_v19, %v2237_v21  ;;  %v2338_v31 = vrot.slane %v2330_v16, %v3893_v25  ;;  %v2345_v9 = vrot.slane %v2331_v17, %v3893_v25 }
 0x54d   : > { %v2346_v37 = vcombine.low %v2257_v0, %v2261_v20  ;;  %v2347_v26 = vcombine.high %v2257_v0, %v2261_v20  ;;  %v2270_v29 = vrot.slane %v2262_v1, %v3893_v25  ;;  %v2277_v39 = vrot.slane %v2263_v3, %v3893_v25  ;;  %v2565_v1 = vld [vmem:[#allocation10] sm:$0xff]  ;;  %v2566_v3 = vld [vmem:[#allocation10 + $0x8] sm:$0xff] }
 0x54e   : > { %v2278_v27 = vcombine.low %v2256_v22, %v2260_v23  ;;  %v2279_v30 = vcombine.high %v2256_v22, %v2260_v23  ;;  %v2567_v23 = vld [vmem:[#allocation10 + $0x10] sm:$0xff] }
 0x54f   : > { %v2354_v32 = vrot.slane %v2346_v37, %v3893_v25  ;;  %v2361_v28 = vrot.slane %v2347_v26, %v3893_v25  ;;  %v2568_v37 = vld [vmem:[#allocation10 + $0x18] sm:$0xff] }
 0x550   : > { %v2286_v41 = vrot.slane %v2278_v27, %v3893_v25  ;;  %v2293_v24 = vrot.slane %v2279_v30, %v3893_v25 }
 0x551   : > { %v2362_v42 = vcombine.low %v2338_v31, %v2354_v32  ;;  %v2363_v43 = vcombine.high %v2338_v31, %v2354_v32  ;;  %v2378_v44 = vcombine.low %v2345_v9, %v2361_v28  ;;  %v2379_v33 = vcombine.high %v2345_v9, %v2361_v28 }
 0x552   : > { %v2294_v46 = vcombine.low %v2270_v29, %v2286_v41  ;;  %v2295_v38 = vcombine.high %v2270_v29, %v2286_v41  ;;  %v2310_v34 = vcombine.low %v2277_v39, %v2293_v24  ;;  %v2311_v35 = vcombine.high %v2277_v39, %v2293_v24 }
 0x553   : > { %v2370_v36 = vrot.slane %v2362_v42, %v3900_v40  ;;  %v2377_v47 = vrot.slane %v2363_v43, %v3900_v40  ;;  %v2386_v48 = vrot.slane %v2378_v44, %v3900_v40  ;;  %v2393_v49 = vrot.slane %v2379_v33, %v3900_v40 }
 0x554   : > { %v2302_v45 = vrot.slane %v2294_v46, %v3900_v40  ;;  %v2309_v50 = vrot.slane %v2295_v38, %v3900_v40  ;;  %v2318_v51 = vrot.slane %v2310_v34, %v3900_v40  ;;  %v2325_v52 = vrot.slane %v2311_v35, %v3900_v40 }
 0x555   : > { %v2466_v53 = vcombine.low %v2370_v36, %v2377_v47  ;;  %v2893_v54 = vcombine.high %v2370_v36, %v2377_v47  ;;  %v2482_v55 = vcombine.low %v2386_v48, %v2393_v49  ;;  %v2894_v56 = vcombine.high %v2386_v48, %v2393_v49  ;;  %v2895_v48 = vld [vmem:[%s4271_s6] ss:$0 sm:$0xff] }
 0x556   : > { %v2398_v57 = vcombine.low %v2302_v45, %v2309_v50  ;;  %v2891_v58 = vcombine.high %v2302_v45, %v2309_v50  ;;  %v2414_v59 = vcombine.low %v2318_v51, %v2325_v52  ;;  %v2892_v60 = vcombine.high %v2318_v51, %v2325_v52  ;;  %v2658_v45 = vld [vmem:[%s372_s19 + $0x8] sm:$0xff]  ;;  %v2657_v52 = vld [vmem:[%s372_s19] sm:$0xff]  ;;  %s3408_s19 = sshll.u32 %s3513_s28, 4  ;;  %s3409_s19 = int_to_ptr.vmem [resolvable:$false] %s3408_s19 }
 0x557   : > { %v2473_v61 = vrot.slane %v2466_v53, %v3893_v25  ;;  %v2481_v62 = vrot.slane %v2893_v54, %v3893_v25  ;;  %v2489_v63 = vrot.slane %v2482_v55, %v3893_v25  ;;  %v2497_v2 = vrot.slane %v2894_v56, %v3893_v25  ;;  %s3410_s30 = scalar_lea.vmem %s3409_s19, 512  ;;  %p3411_p1 = scmp.lt.s32.totalorder %s4213_s3, %s3409_s19 }
 0x558   : > { %v2405_v4 = vrot.slane %v2398_v57, %v3893_v25  ;;  %v2413_v5 = vrot.slane %v2891_v58, %v3893_v25  ;;  %v2421_v6 = vrot.slane %v2414_v59, %v3893_v25  ;;  %v2429_v7 = vrot.slane %v2892_v60, %v3893_v25  ;;  %p3412_p13 = scmp.lt.s32.totalorder %s3410_s30, %s3404_s22 }
 0x559   : > { %v2499_v8 = vcombine.high %v2473_v61, %v2481_v62  ;;  %v2515_v10 = vcombine.high %v2489_v63, %v2497_v2  ;;  %v2498_v11 = vcombine.low %v2473_v61, %v2481_v62  ;;  %v2514_v12 = vcombine.low %v2489_v63, %v2497_v2 }
 0x55a   : > { %v2430_v13 = vcombine.low %v2405_v4, %v2413_v5  ;;  %v2446_v14 = vcombine.low %v2421_v6, %v2429_v7  ;;  %v2431_v15 = vcombine.high %v2405_v4, %v2413_v5  ;;  %v2447_v16 = vcombine.high %v2421_v6, %v2429_v7  ;;  %p3413_p5 = por %p3412_p13, %p3411_p1 }
 0x55b   : > { %v2513_v17 = vrot.slane %v2499_v8, %v3900_v40  ;;  %v2529_v18 = vrot.slane %v2515_v10, %v3900_v40  ;;  %v2506_v19 = vrot.slane %v2498_v11, %v3900_v40  ;;  %v2522_v0 = vrot.slane %v2514_v12, %v3900_v40 }
 0x55c   : > { %v2438_v25 = vrot.slane %v2430_v13, %v3900_v40  ;;  %v2454_v20 = vrot.slane %v2446_v14, %v3900_v40  ;;  %v2445_v21 = vrot.slane %v2431_v15, %v3900_v40  ;;  %v2461_v22 = vrot.slane %v2447_v16, %v3900_v40  ;;  %p3414_p9 = pnand %p3413_p5, %p3407_p8 }
 0x55d   : > { %v2532_v26 = vcombine.low %v2513_v17, %v2529_v18  ;;  %v2531_v27 = vcombine.high %v2506_v19, %v2522_v0  ;;  %v2533_v30 = vcombine.high %v2513_v17, %v2529_v18  ;;  %v2530_v31 = vcombine.low %v2506_v19, %v2522_v0 }
 0x55e   : > { %v2463_v9 = vcombine.high %v2438_v25, %v2454_v20  ;;  %v2464_v32 = vcombine.low %v2445_v21, %v2461_v22  ;;  %v2465_v28 = vcombine.high %v2445_v21, %v2461_v22  ;;  %v3102_v29 = vpack.c.bf16 %v2566_v3, %v2565_v1 }
 0x55f   : > { %2546 = vrot.lane.b32.xlu0 %v2532_v26, %s3510_s21  ;;  %2538 = vrot.lane.b32.xlu1 %v2531_v27, %s3511_s16  ;;  %v2462_v39 = vcombine.low %v2438_v25, %v2454_v20  ;;  %v3106_v41 = vpack.c.bf16 %v2568_v37, %v2567_v23 }
 0x560   : > { %3103 = vmatprep.subr.bf16.mxu0 %v3102_v29 }
 0x561   : > { %3105 = vmatpush3.bf16.msra.mxu0 %v3102_v29 }
 0x562   : > { %3107 = vmatprep.subr.bf16.mxu0 %v3106_v41 }
 0x563   : > { %2536 = vrot.lane.b32.xlu0 %v2463_v9, %s3511_s16  ;;  %2544 = vrot.lane.b32.xlu1 %v2464_v32, %s3510_s21 }
 0x565   : > { %3109 = vmatpush3.bf16.msra.mxu0 %v3106_v41 }
 0x567   : > { %2554 = vrot.lane.b32.xlu0 %v2533_v30, %s3512_s12  ;;  %2552 = vrot.lane.b32.xlu1 %v2465_v28, %s3512_s12 }
 0x5d1   : > { %v2547_v40 = vpop.permute.xlu0 %2546  ;;  %v2539_v24 = vpop.permute.xlu1 %2538 }
 0x5d2   : > { %v2559_v44 = vsel %vm1500_vm1, %v2530_v31, %v2539_v24 }
 0x5d3   : > { %v2561_v34 = vsel %vm1849_vm3, %v2559_v44, %v2547_v40 }
 0x5d5   : > { %v2537_v42 = vpop.permute.xlu0 %2536  ;;  %v2545_v43 = vpop.permute.xlu1 %2544 }
 0x5d6   : > { %v2558_v33 = vsel %vm1500_vm1, %v2462_v39, %v2537_v42 }
 0x5d7   : > { %v2560_v46 = vsel %vm1849_vm3, %v2558_v33, %v2545_v43 }
 0x5d9   : > { %v2555_v38 = vpop.permute.xlu0 %2554  ;;  %v2553_v35 = vpop.permute.xlu1 %2552 }
 0x5da   : > { %v2564_v36 = vsel %vm2562_vm4, %v2561_v34, %v2555_v38  ;;  %v2563_v47 = vsel %vm2562_vm4, %v2560_v46, %v2553_v35 }
 0x5db   : > { %3043 = vmatprep.mubr.msk.f32.mxu0 %vm438_vm0, %v2563_v47 }
 0x5dc   : > { %3044 = vmatmul.mubr.msk.f32.vlgmr.msra.gmra.mrb[8].mxu0 %vm438_vm0, %v2564_v36 }
 0x6af   : > { %v3045_v49 = vpop.f32.mrb[8].mxu0 }
 0x6b0   : > { %v2654_v50 = vadd.f32 %v3045_v49, %v2895_v48  ;;  %v2648_v51 = vpop.f32.mrb[9].mxu0 }
 0x6b1   : > { %v2649_v53 = vadd.f32 %v2895_v48, %v2648_v51 }
 0x6b2   : > { %v2660_v54 = vadd.f32 %v2658_v45, %v2654_v50 }
 0x6b3   : > { %v2659_v55 = vadd.f32 %v2657_v52, %v2649_v53 }
 0x6b4   : > { %2662 = vst.msk [vmem:[%s420_s9 + $0x8] sm:$0xff] %vm438_vm0, %v2660_v54 }
 0x6b5   : > { %2661 = vst.msk [vmem:[%s420_s9] sm:$0xff] %vm438_vm0, %v2659_v55 }
 0x6b6   : > { %3417 = shalt.err (!%p3414_p9)
}
 0x6b7   : > { %s3418_s10 = scalar_lea.hbm %s4211_s17, 256  ;;  %s3422_s1 = scalar_lea.hbm %s4333_s13, 512 }
 0x6b8   : > { %p3419_p6 = scmp.ne.s32.totalorder %s4211_s17, %s3418_s10  ;;  %p3423_p3 = scmp.lt.u32.totalorder %s4211_s17, %s4333_s13 }
 0x6b9   : > { %p3424_p7 = scmp.lt.u32.totalorder %s3422_s1, %s3418_s10  ;;  %p3426_p2 = scmp.lt.u32.totalorder %s3418_s10, %s4211_s17 }
 0x6ba   : > { %p3420_p4 = pnand %p3419_p6, %p4334_p11 }
 0x6bb   : > { %p3425_p12 = por %p3424_p7, %p3423_p3 }
 0x6bc   : > { %p3421_p10 = pneg %p3420_p4 }
 0x6bd   : > { %p3427_p0 = por %p3426_p2, %p3425_p12 }
 0x6bf   : > { %p3428_p8 = pnand %p3427_p0, %p3421_p10 }
 0x6c1   : > { %3431 = shalt.err (!%p3428_p8)
}
 0x6c2   : > { %s3514_s21 = smov 128  }
 0x6c3   : > { %3124 = dma.vmem_to_hbm [thread:$0]  (%p4334_p11), %s4213_s3, 256, %s4211_s17, %s2664_s27, %s3514_s21, %s3514_s21, %s3511_s16  }
 0x6c4 PF: > { %s4335_s12 = sld [smem:[#allocation16_spill]]  ;;  %s4336_s15 = sld [smem:[#allocation19_spill]] }
 0x6c5   : > { %s4337_s20 = sld [smem:[#allocation18_spill]] }
 0x6ca   : > { %s2694_s23 = sand.u32 1, %s4335_s12   ;;  %p4338_p1 = scmp.ne.s32.totalorder %s4336_s15, 0 }
 0x6cb   : > { %p4339_p13 = scmp.ge.s32.totalorder %s4337_s20, 2  ;;  %s2695_s9 = scalar_lea.sflag [#allocation4], %s2694_s23 }
 0x6cd   : > { %p3144_p5 = pnand %p4339_p13, %p4338_p1 }
 0x6cf   : > { %3469 = dma.done.wait (!%p3144_p5), %s2695_s9, 256  }
 0x6d0   : > { %3471 = vsyncadd (!%p3144_p5), %s2695_s9, 4294967040  ;;  %s27_s29 = sadd.s32 1, %s4337_s20   ;;  %s4340_s11 = sld [smem:[#allocation21_spill]] }
 0x6d1   : > { %p24_p9 = scmp.ge.s32.totalorder %s27_s29, 4   ;;  %s4341_s27 = sld [smem:[#allocation17_spill]] }
 0x6d2   : > { %s4342_s28 = sld [smem:[#allocation20_spill]]  ;;  %s4343_s24 = smov %s3478_s25 }
 0x6d3   : > { %s4344_s25 = smov %s3482_s26  ;;  %26 = sbr.rel (!%p24_p9) target bundleno = 14 (0xe), region = 125 }
 0x6d6   : > { %s4345_s26 = smov %s4340_s11 }
 0x6da   :  { %2700 = vsyncpa [#allocation3], 1 }
 0x6db   :  { %2702 = vsyncpa [#allocation3 + $0x1], 1 }
 0x6dc   :  { %2703 = vsyncpa [#allocation6], 1 }
 0x6dd   :  { %2705 = vsyncpa [#allocation6 + $0x1], 1 }
 0x6de   :  { %2706 = vsyncpa [#allocation9], 1 }
 0x6df   :  { %2707 = vsyncpa [#allocation4], 1 }
 0x6e0   :  { %2709 = vsyncpa [#allocation4 + $0x1], 1 }

</bundles_post_ra>
